<compile_context>
chip_gen: v6e
topology: v6e:2x2x1
jax: 0.10.0
libtpu: 0.0.40
codegen_flags: <defaults>
</compile_context>

<pallas_src>
import functools

import jax
import jax.numpy as jnp
from jax.experimental import pallas as pl
from jax.experimental.pallas import tpu as pltpu


# --------------------------------------------------------------------------------------
# Fused GRU forward: one grid step == one chunk of Tc timesteps.
#
#   x_ref    : (Tc*Bp, Iin) bf16   input rows for this chunk (time-major, batch-minor)
#   h0_ref   : (Bp, Hp)     f32    initial hidden state (constant block)
#   w_in_ref : (Iin, 3*Hp)  bf16   input-projection weights, gates (r,z,n) fused on lanes
#   b_in_ref : (1, 3*Hp)    f32    folded biases: r/z carry b_ih+b_hh, n carries b_ih only
#   whh_ref  : (Hp, 3*Hp)   bf16   recurrent weights, gates fused on lanes
#   bhh_n_ref: (1, Hp)      f32    b_hh of the n gate (must stay separate: r*(h@W + b))
#   wlin_ref : (Hp, Op)     bf16   readout weights (Op padded to 128 lanes)
#   blin_ref : (1, Op)      f32    readout bias
#   scores   : (Tc*Bp, Op)  f32    readout for this chunk
#   rnn      : (Tc*Bp, Hp)  f32    hidden states for this chunk (only when write_rnn)
#   h_scr    : (Bp, Hp)     f32    VMEM-carried hidden state across grid chunks
#   gi_scr   : (Tc*Bp, 3Hp) f32    per-chunk input projections (never leaves VMEM)
#   rnn_scr  : (Tc*Bp, Hp)  f32    per-chunk hidden states (never leaves VMEM if !write_rnn)
# --------------------------------------------------------------------------------------
def _gru_fused_kernel(x_ref, h0_ref, w_in_ref, b_in_ref, whh_ref, bhh_n_ref,
                      wlin_ref, blin_ref, *rest,
                      t_chunk, batch_p, hidden_p, write_rnn):
    if write_rnn:
        scores_ref, rnn_ref, h_scr, gi_scr, rnn_scr = rest
    else:
        scores_ref, h_scr, gi_scr, rnn_scr = rest
        rnn_ref = None

    Tc, Bp, Hp = t_chunk, batch_p, hidden_p
    c = pl.program_id(0)

    @pl.when(c == 0)
    def _():
        h_scr[...] = h0_ref[...]

    # (a) Per-chunk input projection: one batched GEMM (bf16 operands, f32 accumulation),
    # hidden under the MXU slack of the serialized recurrence. gi stays in VMEM.
    gi_scr[...] = (jnp.dot(x_ref[...], w_in_ref[...],
                           preferred_element_type=jnp.float32) + b_in_ref[...])

    # Hoist the (tiny) bias broadcast out of the unrolled loop (JAX does not CSE it).
    b_n = jnp.broadcast_to(bhh_n_ref[...], (Bp, Hp))

    def step(t, h):
        row = pl.multiple_of(t * Bp, 8)
        hb = h.astype(jnp.bfloat16)                 # bf16 MXU operand, f32 accumulation
        # Single fused 3-gate recurrent matmul. Reference the ref directly so Mosaic
        # streams the weight from VMEM instead of pinning Hp*3*Hp values live across the
        # unrolled loop (spill hazard at Hp >= 128).
        # TODO(synk): hold W_hh staged on the MXU across the chunk via
        # pltpu.matmul_push_rhs / matmul_acc_lhs / matmul_pop to avoid re-streaming the
        # weight every timestep.
        gh = jnp.dot(hb, whh_ref[...], preferred_element_type=jnp.float32)  # (Bp, 3*Hp)
        gi = gi_scr[pl.ds(row, Bp), :]                                      # (Bp, 3*Hp)
        r = jax.nn.sigmoid(gi[:, 0:Hp] + gh[:, 0:Hp])
        z = jax.nn.sigmoid(gi[:, Hp:2 * Hp] + gh[:, Hp:2 * Hp])
        n = jnp.tanh(gi[:, 2 * Hp:3 * Hp] + r * (gh[:, 2 * Hp:3 * Hp] + b_n))
        h_new = (1.0 - z) * n + z * h
        rnn_scr[pl.ds(row, Bp), :] = h_new
        return h_new

    # (b) Fully unrolled (t_chunk is small/static) so the LLO scheduler can overlap
    # MXU (h@W_hh), EUP (sigmoid/tanh) and the VMEM stores across timesteps.
    h_last = jax.lax.fori_loop(0, Tc, step, h_scr[...], unroll=True)
    h_scr[...] = h_last

    # (c) Per-chunk readout GEMM; the output lane dim is padded to 128 so the store is a
    # lane-dense (unmasked) vst instead of masked partial stores at O=4.
    scores_ref[...] = (jnp.dot(rnn_scr[...].astype(jnp.bfloat16), wlin_ref[...],
                               preferred_element_type=jnp.float32) + blin_ref[...])

    if write_rnn:
        rnn_ref[...] = rnn_scr[...]


def _round_up(n, m):
    return ((n + m - 1) // m) * m


def _pad2(a, shape):
    return jnp.pad(a, [(0, s - d) for d, s in zip(a.shape, shape)])


@functools.partial(jax.jit, static_argnames=("output_h0", "get_rnnout", "t_chunk"))
def rnn_net_forward(x, h0, params, *, output_h0=False, get_rnnout=False, t_chunk=32):
    """RNNnet.forward: x (S, B, I), h0 (B, H). Returns scores (S, B, O) [and rnn_out]."""
    S, B, Iin = x.shape
    H = params["whh_T"].shape[0]
    O = params["wlin_T"].shape[1]
    f32, bf16 = jnp.float32, jnp.bfloat16

    # Hardware-friendly padding: B -> sublane multiple (8), H/O -> lane multiple (128),
    # S -> multiple of the time chunk. Padded hidden lanes stay exactly zero through the
    # GRU (zero weights/biases -> n=0, h_new=0), so they never pollute real lanes.
    Bp = _round_up(B, 8)
    Hp = _round_up(H, 128)
    Op = _round_up(O, 128)
    Tc = max(1, min(t_chunk, S))
    Sp = _round_up(S, Tc)
    # TODO(synk): per-generation tuning — on v7x (64 MiB VMEM) lower t_chunk, add
    # pl.Buffered(1) on the constant weight BlockSpecs and size
    # CompilerParams(vmem_limit_bytes=...) when Bp*Hp is large; on v5e/v6e (128 MiB)
    # raise t_chunk to further amortize the ~0.35 us/grid-step overhead.

    # ---- Parameter prep: split per gate (PyTorch order r, z, n), fold biases, pad ----
    wih_T = params["wih_T"].astype(f32)
    whh_T = params["whh_T"].astype(f32)
    bih = params["bih"].astype(f32)
    bhh = params["bhh"].astype(f32)

    wih_g = [wih_T[:, g * H:(g + 1) * H] for g in range(3)]
    whh_g = [whh_T[:, g * H:(g + 1) * H] for g in range(3)]
    bih_g = [bih[:, g * H:(g + 1) * H] for g in range(3)]
    bhh_g = [bhh[:, g * H:(g + 1) * H] for g in range(3)]

    # r/z gates: b_ih + b_hh folded into the precomputed input projection;
    # n gate keeps b_hh separate (coupled through r * (h @ W_hh_n + b_hh_n)).
    b_fold = [bih_g[0] + bhh_g[0], bih_g[1] + bhh_g[1], bih_g[2]]

    w_in = jnp.concatenate([_pad2(w, (Iin, Hp)) for w in wih_g], axis=1).astype(bf16)
    b_in = jnp.concatenate([_pad2(b, (1, Hp)) for b in b_fold], axis=1)          # (1, 3Hp)
    w_hh = jnp.concatenate([_pad2(w, (Hp, Hp)) for w in whh_g], axis=1).astype(bf16)
    bhh_n = _pad2(bhh_g[2], (1, Hp))

    w_lin = _pad2(params["wlin_T"].astype(f32), (Hp, Op)).astype(bf16)
    b_lin = _pad2(params["blin"].astype(f32), (1, Op))

    # ---- Activations: pad, cast to bf16, flatten (time, batch) to one sublane axis ----
    x_p = jnp.pad(x, ((0, Sp - S), (0, Bp - B), (0, 0))).astype(bf16)
    x2 = x_p.reshape(Sp * Bp, Iin)
    h0_p = _pad2(h0.astype(f32), (Bp, Hp))

    n_chunks = Sp // Tc
    const = lambda shape: pl.BlockSpec(shape, lambda c: (0,) * len(shape))

    out_shape = [jax.ShapeDtypeStruct((Sp * Bp, Op), f32)]
    out_specs = [pl.BlockSpec((Tc * Bp, Op), lambda c: (c, 0))]
    if get_rnnout:
        # TODO(synk): rnn_out could be emitted as bf16 (h stays f32 in scratch) to halve
        # the writeback when internal states are requested at production sizes.
        out_shape.append(jax.ShapeDtypeStruct((Sp * Bp, Hp), f32))
        out_specs.append(pl.BlockSpec((Tc * Bp, Hp), lambda c: (c, 0)))

    kernel = functools.partial(_gru_fused_kernel, t_chunk=Tc, batch_p=Bp, hidden_p=Hp,
                               write_rnn=get_rnnout)

    outs = pl.pallas_call(
        kernel,
        out_shape=tuple(out_shape),
        grid_spec=pltpu.PrefetchScalarGridSpec(
            num_scalar_prefetch=0,
            grid=(n_chunks,),
            in_specs=[
                pl.BlockSpec((Tc * Bp, Iin), lambda c: (c, 0)),   # x chunk (bf16)
                const((Bp, Hp)),                                  # h0
                const((Iin, 3 * Hp)),                             # W_in  (bf16, fused gates)
                const((1, 3 * Hp)),                               # folded input biases
                const((Hp, 3 * Hp)),                              # W_hh  (bf16, fused gates)
                const((1, Hp)),                                   # b_hh of the n gate
                const((Hp, Op)),                                  # W_lin (bf16)
                const((1, Op)),                                   # b_lin
            ],
            out_specs=tuple(out_specs),
            scratch_shapes=[
                pltpu.VMEM((Bp, Hp), f32),            # carried hidden state
                pltpu.VMEM((Tc * Bp, 3 * Hp), f32),   # per-chunk input projections
                pltpu.VMEM((Tc * Bp, Hp), f32),       # per-chunk hidden states
            ],
        ),
        compiler_params=pltpu.CompilerParams(
            # Strictly sequential recurrence across chunks.
            # TODO(synk): on v7x, add a leading "parallel" batch-tile grid axis (with a
            # per-shard h scratch) to use the second TensorCore when batch is large.
            dimension_semantics=("arbitrary",)),
    )(x2, h0_p, w_in, b_in, w_hh, bhh_n, w_lin, b_lin)

    scores = outs[0].reshape(Sp, Bp, Op)[:S, :B, :O]
    if get_rnnout:
        rnn_out = outs[1].reshape(Sp, Bp, Hp)[:S, :B, :H]

    if output_h0:
        # Prepend readout of h0 (tiny glue) — matches torch.cat((h0_expand, rnn_out), 0)
        scores0 = (h0 @ params["wlin_T"] + params["blin"])[None]             # (1, B, O)
        scores = jnp.concatenate([scores0, scores], axis=0)
        if get_rnnout:
            rnn_out = jnp.concatenate([h0[None], rnn_out], axis=0)

    if get_rnnout:
        return scores, rnn_out
    return scores


def _ref_forward(x, h0, p):
    """Pure-JAX f32 reference of the same GRU + Linear readout."""
    H = h0.shape[-1]

    def step(h, xt):
        gi = xt @ p["wih_T"] + p["bih"][0]
        gh = h @ p["whh_T"] + p["bhh"][0]
        r = jax.nn.sigmoid(gi[:, :H] + gh[:, :H])
        z = jax.nn.sigmoid(gi[:, H:2 * H] + gh[:, H:2 * H])
        n = jnp.tanh(gi[:, 2 * H:] + r * gh[:, 2 * H:])
        hn = (1.0 - z) * n + z * h
        return hn, hn

    _, hs = jax.lax.scan(step, h0, x)
    return hs @ p["wlin_T"] + p["blin"], hs


def init_params(key, input_dim, hidden_dim, output_dim):
    """Deterministic init mimicking nn.GRU / nn.Linear uniform ranges."""
    ks = jax.random.split(key, 6)
    k_rnn = 1.0 / jnp.sqrt(hidden_dim)
    u = lambda k, shape, bound: jax.random.uniform(k, shape, jnp.float32, -bound, bound)
    return {
        "wih_T": u(ks[0], (input_dim, 3 * hidden_dim), k_rnn),
        "whh_T": u(ks[1], (hidden_dim, 3 * hidden_dim), k_rnn),
        "bih":   u(ks[2], (1, 3 * hidden_dim), k_rnn),
        "bhh":   u(ks[3], (1, 3 * hidden_dim), k_rnn),
        "wlin_T": u(ks[4], (hidden_dim, output_dim), 1.0 / jnp.sqrt(hidden_dim)),
        "blin":   u(ks[5], (1, output_dim), 1.0 / jnp.sqrt(hidden_dim)),
    }


if __name__ == "__main__":
    seq_len, batch, input_dim = 8, 2, 4
    hidden_dim, output_dim = 32, 4

    key = jax.random.PRNGKey(0)
    kx, kp = jax.random.split(key)

    x = jax.random.normal(kx, (seq_len, batch, input_dim), jnp.float32)
    h0 = jnp.zeros((batch, hidden_dim), jnp.float32)   # h0 = zeros, expanded over batch
    params = init_params(kp, input_dim, hidden_dim, output_dim)

    scores, rnn_out = rnn_net_forward(x, h0, params, output_h0=False, get_rnnout=True)
    scores = jax.block_until_ready(scores)
    rnn_out = jax.block_until_ready(rnn_out)

    ref_scores, ref_hs = _ref_forward(x, h0, params)
    assert scores.shape == (seq_len, batch, output_dim)
    assert rnn_out.shape == (seq_len, batch, hidden_dim)
    # Loosened tolerance: x / W_in / W_hh / W_lin (and h at the recurrent matmul) are bf16
    # in the kernel (f32 accumulation); the reference is pure f32.
    assert jnp.allclose(rnn_out, ref_hs, atol=3e-2, rtol=3e-2), float(
        jnp.max(jnp.abs(rnn_out - ref_hs)))
    assert jnp.allclose(scores, ref_scores, atol=5e-2, rtol=5e-2), float(
        jnp.max(jnp.abs(scores - ref_scores)))

    # Exercise the scores-only variant (no rnn_out writeback: HBM traffic = x + scores).
    scores_only = jax.block_until_ready(
        rnn_net_forward(x, h0, params, output_h0=False, get_rnnout=False))
    assert jnp.allclose(scores_only, ref_scores, atol=5e-2, rtol=5e-2), float(
        jnp.max(jnp.abs(scores_only - ref_scores)))

    print("KERNEL_OK")
</pallas_src>

<mosaic_0001>
module attributes {stable_mosaic.version = 11 : i64} {
  func.func @_gru_fused_kernel(%arg0: i32, %arg1: memref<64x4xbf16, #tpu.memory_space<vmem>>, %arg2: memref<8x128xf32, #tpu.memory_space<vmem>>, %arg3: memref<4x384xbf16, #tpu.memory_space<vmem>>, %arg4: memref<1x384xf32, #tpu.memory_space<vmem>>, %arg5: memref<128x384xbf16, #tpu.memory_space<vmem>>, %arg6: memref<1x128xf32, #tpu.memory_space<vmem>>, %arg7: memref<128x128xbf16, #tpu.memory_space<vmem>>, %arg8: memref<1x128xf32, #tpu.memory_space<vmem>>, %arg9: memref<64x128xf32, #tpu.memory_space<vmem>>, %arg10: memref<64x128xf32, #tpu.memory_space<vmem>>, %arg11: memref<8x128xf32, #tpu.memory_space<vmem>>, %arg12: memref<64x384xf32, #tpu.memory_space<vmem>>, %arg13: memref<64x128xf32, #tpu.memory_space<vmem>>) attributes {dimension_semantics = [#tpu.dimension_semantics<arbitrary>], iteration_bounds = array<i64: 1>, scalar_prefetch = 0 : i64, scratch_operands = 3 : i64, tpu.core_type = #tpu.core_type<tc>, window_params = [{transform_indices = @transform_0, window_bounds = array<i64: 64, 4>}, {pipeline_mode = #tpu.pipeline_mode<synchronous>, transform_indices = @transform_1, window_bounds = array<i64: 8, 128>}, {pipeline_mode = #tpu.pipeline_mode<synchronous>, transform_indices = @transform_2, window_bounds = array<i64: 4, 384>}, {pipeline_mode = #tpu.pipeline_mode<synchronous>, transform_indices = @transform_3, window_bounds = array<i64: 1, 384>}, {pipeline_mode = #tpu.pipeline_mode<synchronous>, transform_indices = @transform_4, window_bounds = array<i64: 128, 384>}, {pipeline_mode = #tpu.pipeline_mode<synchronous>, transform_indices = @transform_5, window_bounds = array<i64: 1, 128>}, {pipeline_mode = #tpu.pipeline_mode<synchronous>, transform_indices = @transform_6, window_bounds = array<i64: 128, 128>}, {pipeline_mode = #tpu.pipeline_mode<synchronous>, transform_indices = @transform_7, window_bounds = array<i64: 1, 128>}, {transform_indices = @transform_8, window_bounds = array<i64: 64, 128>}, {transform_indices = @transform_9, window_bounds = array<i64: 64, 128>}]} {
    %c0_i32 = arith.constant 0 : i32
    %0 = arith.cmpi eq, %arg0, %c0_i32 : i32
    %1 = arith.extui %0 : i1 to i32
    %c0_i32_0 = arith.constant 0 : i32
    %2 = arith.cmpi ne, %1, %c0_i32_0 : i32
    scf.if %2 {
      %c0_100 = arith.constant 0 : index
      %c0_101 = arith.constant 0 : index
      %313 = vector.load %arg2[%c0_100, %c0_101] : memref<8x128xf32, #tpu.memory_space<vmem>>, vector<8x128xf32>
      %c0_102 = arith.constant 0 : index
      %c0_103 = arith.constant 0 : index
      %314 = vector.load %arg11[%c0_102, %c0_103] : memref<8x128xf32, #tpu.memory_space<vmem>>, vector<8x128xf32>
      tpu.vector_store %arg11[%c0_102, %c0_103], %313 {strides = array<i32>} : memref<8x128xf32, #tpu.memory_space<vmem>>, vector<8x128xf32>,
    } else {
    }
    %c0 = arith.constant 0 : index
    %c0_1 = arith.constant 0 : index
    %3 = vector.load %arg1[%c0, %c0_1] : memref<64x4xbf16, #tpu.memory_space<vmem>>, vector<64x4xbf16>
    %c0_2 = arith.constant 0 : index
    %c0_3 = arith.constant 0 : index
    %4 = vector.load %arg3[%c0_2, %c0_3] : memref<4x384xbf16, #tpu.memory_space<vmem>>, vector<4x384xbf16>
    %cst = arith.constant dense<0.000000e+00> : vector<64x384xf32>
    %5 = tpu.matmul %3, %4, %cst {dimension_numbers = #tpu.dot_dimension_numbers<[1], [0], [0], [1], [0, 0, 1, 1], [], []>} : vector<64x4xbf16>, vector<4x384xbf16>, vector<64x384xf32> -> vector<64x384xf32>
    %c0_4 = arith.constant 0 : index
    %c0_5 = arith.constant 0 : index
    %6 = vector.load %arg4[%c0_4, %c0_5] : memref<1x384xf32, #tpu.memory_space<vmem>>, vector<1x384xf32>
    %7 = vector.broadcast %6 : vector<1x384xf32> to vector<64x384xf32>
    %8 = arith.addf %5, %7 : vector<64x384xf32>
    %c0_6 = arith.constant 0 : index
    %c0_7 = arith.constant 0 : index
    %9 = vector.load %arg12[%c0_6, %c0_7] : memref<64x384xf32, #tpu.memory_space<vmem>>, vector<64x384xf32>
    tpu.vector_store %arg12[%c0_6, %c0_7], %8 {strides = array<i32>} : memref<64x384xf32, #tpu.memory_space<vmem>>, vector<64x384xf32>,
    %c0_8 = arith.constant 0 : index
    %c0_9 = arith.constant 0 : index
    %10 = vector.load %arg6[%c0_8, %c0_9] : memref<1x128xf32, #tpu.memory_space<vmem>>, vector<1x128xf32>
    %11 = vector.shape_cast %10 : vector<1x128xf32> to vector<1x128xf32>
    %12 = vector.broadcast %11 : vector<1x128xf32> to vector<8x128xf32>
    %c0_10 = arith.constant 0 : index
    %c0_11 = arith.constant 0 : index
    %13 = vector.load %arg11[%c0_10, %c0_11] : memref<8x128xf32, #tpu.memory_space<vmem>>, vector<8x128xf32>
    %c0_i32_12 = arith.constant 0 : i32
    %c8_i32 = arith.constant 8 : i32
    %14 = arith.muli %c0_i32_12, %c8_i32 : i32
    %15 = tpu.assume_multiple %14, 8 : i32
    %16 = arith.truncf %13 : vector<8x128xf32> to vector<8x128xbf16>
    %c0_13 = arith.constant 0 : index
    %c0_14 = arith.constant 0 : index
    %17 = vector.load %arg5[%c0_13, %c0_14] : memref<128x384xbf16, #tpu.memory_space<vmem>>, vector<128x384xbf16>
    %cst_15 = arith.constant dense<0.000000e+00> : vector<8x384xf32>
    %18 = tpu.matmul %16, %17, %cst_15 {dimension_numbers = #tpu.dot_dimension_numbers<[1], [0], [0], [1], [0, 0, 1, 1], [], []>} : vector<8x128xbf16>, vector<128x384xbf16>, vector<8x384xf32> -> vector<8x384xf32>
    %19 = arith.index_cast %15 : i32 to index
    %c0_16 = arith.constant 0 : index
    %20 = vector.load %arg12[%19, %c0_16] : memref<64x384xf32, #tpu.memory_space<vmem>>, vector<8x384xf32>
    %21 = vector.extract_strided_slice %20 {offsets = [0, 0], sizes = [8, 128], strides = [1, 1]} : vector<8x384xf32> to vector<8x128xf32>
    %22 = vector.extract_strided_slice %18 {offsets = [0, 0], sizes = [8, 128], strides = [1, 1]} : vector<8x384xf32> to vector<8x128xf32>
    %23 = arith.addf %21, %22 : vector<8x128xf32>
    %24 = arith.negf %23 : vector<8x128xf32>
    %25 = math.exp %24 : vector<8x128xf32>
    %cst_17 = arith.constant 1.000000e+00 : f32
    %26 = vector.broadcast %cst_17 : f32 to vector<8x128xf32>
    %27 = arith.addf %26, %25 : vector<8x128xf32>
    %28 = arith.divf %26, %27 : vector<8x128xf32>
    %29 = vector.extract_strided_slice %20 {offsets = [0, 128], sizes = [8, 128], strides = [1, 1]} : vector<8x384xf32> to vector<8x128xf32>
    %30 = vector.extract_strided_slice %18 {offsets = [0, 128], sizes = [8, 128], strides = [1, 1]} : vector<8x384xf32> to vector<8x128xf32>
    %31 = arith.addf %29, %30 : vector<8x128xf32>
    %32 = arith.negf %31 : vector<8x128xf32>
    %33 = math.exp %32 : vector<8x128xf32>
    %cst_18 = arith.constant 1.000000e+00 : f32
    %34 = vector.broadcast %cst_18 : f32 to vector<8x128xf32>
    %35 = arith.addf %34, %33 : vector<8x128xf32>
    %36 = arith.divf %34, %35 : vector<8x128xf32>
    %37 = vector.extract_strided_slice %20 {offsets = [0, 256], sizes = [8, 128], strides = [1, 1]} : vector<8x384xf32> to vector<8x128xf32>
    %38 = vector.extract_strided_slice %18 {offsets = [0, 256], sizes = [8, 128], strides = [1, 1]} : vector<8x384xf32> to vector<8x128xf32>
    %39 = arith.addf %38, %12 : vector<8x128xf32>
    %40 = arith.mulf %28, %39 : vector<8x128xf32>
    %41 = arith.addf %37, %40 : vector<8x128xf32>
    %42 = math.tanh %41 : vector<8x128xf32>
    %cst_19 = arith.constant 1.000000e+00 : f32
    %43 = vector.broadcast %cst_19 : f32 to vector<8x128xf32>
    %44 = arith.subf %43, %36 : vector<8x128xf32>
    %45 = arith.mulf %44, %42 : vector<8x128xf32>
    %46 = arith.mulf %36, %13 : vector<8x128xf32>
    %47 = arith.addf %45, %46 : vector<8x128xf32>
    %48 = arith.index_cast %15 : i32 to index
    %c0_20 = arith.constant 0 : index
    %49 = vector.load %arg13[%48, %c0_20] : memref<64x128xf32, #tpu.memory_space<vmem>>, vector<8x128xf32>
    tpu.vector_store %arg13[%48, %c0_20], %47 {strides = array<i32>} : memref<64x128xf32, #tpu.memory_space<vmem>>, vector<8x128xf32>,
    %c1_i32 = arith.constant 1 : i32
    %c8_i32_21 = arith.constant 8 : i32
    %50 = arith.muli %c1_i32, %c8_i32_21 : i32
    %51 = tpu.assume_multiple %50, 8 : i32
    %52 = arith.truncf %47 : vector<8x128xf32> to vector<8x128xbf16>
    %c0_22 = arith.constant 0 : index
    %c0_23 = arith.constant 0 : index
    %53 = vector.load %arg5[%c0_22, %c0_23] : memref<128x384xbf16, #tpu.memory_space<vmem>>, vector<128x384xbf16>
    %cst_24 = arith.constant dense<0.000000e+00> : vector<8x384xf32>
    %54 = tpu.matmul %52, %53, %cst_24 {dimension_numbers = #tpu.dot_dimension_numbers<[1], [0], [0], [1], [0, 0, 1, 1], [], []>} : vector<8x128xbf16>, vector<128x384xbf16>, vector<8x384xf32> -> vector<8x384xf32>
    %55 = arith.index_cast %51 : i32 to index
    %c0_25 = arith.constant 0 : index
    %56 = vector.load %arg12[%55, %c0_25] : memref<64x384xf32, #tpu.memory_space<vmem>>, vector<8x384xf32>
    %57 = vector.extract_strided_slice %56 {offsets = [0, 0], sizes = [8, 128], strides = [1, 1]} : vector<8x384xf32> to vector<8x128xf32>
    %58 = vector.extract_strided_slice %54 {offsets = [0, 0], sizes = [8, 128], strides = [1, 1]} : vector<8x384xf32> to vector<8x128xf32>
    %59 = arith.addf %57, %58 : vector<8x128xf32>
    %60 = arith.negf %59 : vector<8x128xf32>
    %61 = math.exp %60 : vector<8x128xf32>
    %cst_26 = arith.constant 1.000000e+00 : f32
    %62 = vector.broadcast %cst_26 : f32 to vector<8x128xf32>
    %63 = arith.addf %62, %61 : vector<8x128xf32>
    %64 = arith.divf %62, %63 : vector<8x128xf32>
    %65 = vector.extract_strided_slice %56 {offsets = [0, 128], sizes = [8, 128], strides = [1, 1]} : vector<8x384xf32> to vector<8x128xf32>
    %66 = vector.extract_strided_slice %54 {offsets = [0, 128], sizes = [8, 128], strides = [1, 1]} : vector<8x384xf32> to vector<8x128xf32>
    %67 = arith.addf %65, %66 : vector<8x128xf32>
    %68 = arith.negf %67 : vector<8x128xf32>
    %69 = math.exp %68 : vector<8x128xf32>
    %cst_27 = arith.constant 1.000000e+00 : f32
    %70 = vector.broadcast %cst_27 : f32 to vector<8x128xf32>
    %71 = arith.addf %70, %69 : vector<8x128xf32>
    %72 = arith.divf %70, %71 : vector<8x128xf32>
    %73 = vector.extract_strided_slice %56 {offsets = [0, 256], sizes = [8, 128], strides = [1, 1]} : vector<8x384xf32> to vector<8x128xf32>
    %74 = vector.extract_strided_slice %54 {offsets = [0, 256], sizes = [8, 128], strides = [1, 1]} : vector<8x384xf32> to vector<8x128xf32>
    %75 = arith.addf %74, %12 : vector<8x128xf32>
    %76 = arith.mulf %64, %75 : vector<8x128xf32>
    %77 = arith.addf %73, %76 : vector<8x128xf32>
    %78 = math.tanh %77 : vector<8x128xf32>
    %cst_28 = arith.constant 1.000000e+00 : f32
    %79 = vector.broadcast %cst_28 : f32 to vector<8x128xf32>
    %80 = arith.subf %79, %72 : vector<8x128xf32>
    %81 = arith.mulf %80, %78 : vector<8x128xf32>
    %82 = arith.mulf %72, %47 : vector<8x128xf32>
    %83 = arith.addf %81, %82 : vector<8x128xf32>
    %84 = arith.index_cast %51 : i32 to index
    %c0_29 = arith.constant 0 : index
    %85 = vector.load %arg13[%84, %c0_29] : memref<64x128xf32, #tpu.memory_space<vmem>>, vector<8x128xf32>
    tpu.vector_store %arg13[%84, %c0_29], %83 {strides = array<i32>} : memref<64x128xf32, #tpu.memory_space<vmem>>, vector<8x128xf32>,
    %c2_i32 = arith.constant 2 : i32
    %c8_i32_30 = arith.constant 8 : i32
    %86 = arith.muli %c2_i32, %c8_i32_30 : i32
    %87 = tpu.assume_multiple %86, 8 : i32
    %88 = arith.truncf %83 : vector<8x128xf32> to vector<8x128xbf16>
    %c0_31 = arith.constant 0 : index
    %c0_32 = arith.constant 0 : index
    %89 = vector.load %arg5[%c0_31, %c0_32] : memref<128x384xbf16, #tpu.memory_space<vmem>>, vector<128x384xbf16>
    %cst_33 = arith.constant dense<0.000000e+00> : vector<8x384xf32>
    %90 = tpu.matmul %88, %89, %cst_33 {dimension_numbers = #tpu.dot_dimension_numbers<[1], [0], [0], [1], [0, 0, 1, 1], [], []>} : vector<8x128xbf16>, vector<128x384xbf16>, vector<8x384xf32> -> vector<8x384xf32>
    %91 = arith.index_cast %87 : i32 to index
    %c0_34 = arith.constant 0 : index
    %92 = vector.load %arg12[%91, %c0_34] : memref<64x384xf32, #tpu.memory_space<vmem>>, vector<8x384xf32>
    %93 = vector.extract_strided_slice %92 {offsets = [0, 0], sizes = [8, 128], strides = [1, 1]} : vector<8x384xf32> to vector<8x128xf32>
    %94 = vector.extract_strided_slice %90 {offsets = [0, 0], sizes = [8, 128], strides = [1, 1]} : vector<8x384xf32> to vector<8x128xf32>
    %95 = arith.addf %93, %94 : vector<8x128xf32>
    %96 = arith.negf %95 : vector<8x128xf32>
    %97 = math.exp %96 : vector<8x128xf32>
    %cst_35 = arith.constant 1.000000e+00 : f32
    %98 = vector.broadcast %cst_35 : f32 to vector<8x128xf32>
    %99 = arith.addf %98, %97 : vector<8x128xf32>
    %100 = arith.divf %98, %99 : vector<8x128xf32>
    %101 = vector.extract_strided_slice %92 {offsets = [0, 128], sizes = [8, 128], strides = [1, 1]} : vector<8x384xf32> to vector<8x128xf32>
    %102 = vector.extract_strided_slice %90 {offsets = [0, 128], sizes = [8, 128], strides = [1, 1]} : vector<8x384xf32> to vector<8x128xf32>
    %103 = arith.addf %101, %102 : vector<8x128xf32>
    %104 = arith.negf %103 : vector<8x128xf32>
    %105 = math.exp %104 : vector<8x128xf32>
    %cst_36 = arith.constant 1.000000e+00 : f32
    %106 = vector.broadcast %cst_36 : f32 to vector<8x128xf32>
    %107 = arith.addf %106, %105 : vector<8x128xf32>
    %108 = arith.divf %106, %107 : vector<8x128xf32>
    %109 = vector.extract_strided_slice %92 {offsets = [0, 256], sizes = [8, 128], strides = [1, 1]} : vector<8x384xf32> to vector<8x128xf32>
    %110 = vector.extract_strided_slice %90 {offsets = [0, 256], sizes = [8, 128], strides = [1, 1]} : vector<8x384xf32> to vector<8x128xf32>
    %111 = arith.addf %110, %12 : vector<8x128xf32>
    %112 = arith.mulf %100, %111 : vector<8x128xf32>
    %113 = arith.addf %109, %112 : vector<8x128xf32>
    %114 = math.tanh %113 : vector<8x128xf32>
    %cst_37 = arith.constant 1.000000e+00 : f32
    %115 = vector.broadcast %cst_37 : f32 to vector<8x128xf32>
    %116 = arith.subf %115, %108 : vector<8x128xf32>
    %117 = arith.mulf %116, %114 : vector<8x128xf32>
    %118 = arith.mulf %108, %83 : vector<8x128xf32>
    %119 = arith.addf %117, %118 : vector<8x128xf32>
    %120 = arith.index_cast %87 : i32 to index
    %c0_38 = arith.constant 0 : index
    %121 = vector.load %arg13[%120, %c0_38] : memref<64x128xf32, #tpu.memory_space<vmem>>, vector<8x128xf32>
    tpu.vector_store %arg13[%120, %c0_38], %119 {strides = array<i32>} : memref<64x128xf32, #tpu.memory_space<vmem>>, vector<8x128xf32>,
    %c3_i32 = arith.constant 3 : i32
    %c8_i32_39 = arith.constant 8 : i32
    %122 = arith.muli %c3_i32, %c8_i32_39 : i32
    %123 = tpu.assume_multiple %122, 8 : i32
    %124 = arith.truncf %119 : vector<8x128xf32> to vector<8x128xbf16>
    %c0_40 = arith.constant 0 : index
    %c0_41 = arith.constant 0 : index
    %125 = vector.load %arg5[%c0_40, %c0_41] : memref<128x384xbf16, #tpu.memory_space<vmem>>, vector<128x384xbf16>
    %cst_42 = arith.constant dense<0.000000e+00> : vector<8x384xf32>
    %126 = tpu.matmul %124, %125, %cst_42 {dimension_numbers = #tpu.dot_dimension_numbers<[1], [0], [0], [1], [0, 0, 1, 1], [], []>} : vector<8x128xbf16>, vector<128x384xbf16>, vector<8x384xf32> -> vector<8x384xf32>
    %127 = arith.index_cast %123 : i32 to index
    %c0_43 = arith.constant 0 : index
    %128 = vector.load %arg12[%127, %c0_43] : memref<64x384xf32, #tpu.memory_space<vmem>>, vector<8x384xf32>
    %129 = vector.extract_strided_slice %128 {offsets = [0, 0], sizes = [8, 128], strides = [1, 1]} : vector<8x384xf32> to vector<8x128xf32>
    %130 = vector.extract_strided_slice %126 {offsets = [0, 0], sizes = [8, 128], strides = [1, 1]} : vector<8x384xf32> to vector<8x128xf32>
    %131 = arith.addf %129, %130 : vector<8x128xf32>
    %132 = arith.negf %131 : vector<8x128xf32>
    %133 = math.exp %132 : vector<8x128xf32>
    %cst_44 = arith.constant 1.000000e+00 : f32
    %134 = vector.broadcast %cst_44 : f32 to vector<8x128xf32>
    %135 = arith.addf %134, %133 : vector<8x128xf32>
    %136 = arith.divf %134, %135 : vector<8x128xf32>
    %137 = vector.extract_strided_slice %128 {offsets = [0, 128], sizes = [8, 128], strides = [1, 1]} : vector<8x384xf32> to vector<8x128xf32>
    %138 = vector.extract_strided_slice %126 {offsets = [0, 128], sizes = [8, 128], strides = [1, 1]} : vector<8x384xf32> to vector<8x128xf32>
    %139 = arith.addf %137, %138 : vector<8x128xf32>
    %140 = arith.negf %139 : vector<8x128xf32>
    %141 = math.exp %140 : vector<8x128xf32>
    %cst_45 = arith.constant 1.000000e+00 : f32
    %142 = vector.broadcast %cst_45 : f32 to vector<8x128xf32>
    %143 = arith.addf %142, %141 : vector<8x128xf32>
    %144 = arith.divf %142, %143 : vector<8x128xf32>
    %145 = vector.extract_strided_slice %128 {offsets = [0, 256], sizes = [8, 128], strides = [1, 1]} : vector<8x384xf32> to vector<8x128xf32>
    %146 = vector.extract_strided_slice %126 {offsets = [0, 256], sizes = [8, 128], strides = [1, 1]} : vector<8x384xf32> to vector<8x128xf32>
    %147 = arith.addf %146, %12 : vector<8x128xf32>
    %148 = arith.mulf %136, %147 : vector<8x128xf32>
    %149 = arith.addf %145, %148 : vector<8x128xf32>
    %150 = math.tanh %149 : vector<8x128xf32>
    %cst_46 = arith.constant 1.000000e+00 : f32
    %151 = vector.broadcast %cst_46 : f32 to vector<8x128xf32>
    %152 = arith.subf %151, %144 : vector<8x128xf32>
    %153 = arith.mulf %152, %150 : vector<8x128xf32>
    %154 = arith.mulf %144, %119 : vector<8x128xf32>
    %155 = arith.addf %153, %154 : vector<8x128xf32>
    %156 = arith.index_cast %123 : i32 to index
    %c0_47 = arith.constant 0 : index
    %157 = vector.load %arg13[%156, %c0_47] : memref<64x128xf32, #tpu.memory_space<vmem>>, vector<8x128xf32>
    tpu.vector_store %arg13[%156, %c0_47], %155 {strides = array<i32>} : memref<64x128xf32, #tpu.memory_space<vmem>>, vector<8x128xf32>,
    %c4_i32 = arith.constant 4 : i32
    %c8_i32_48 = arith.constant 8 : i32
    %158 = arith.muli %c4_i32, %c8_i32_48 : i32
    %159 = tpu.assume_multiple %158, 8 : i32
    %160 = arith.truncf %155 : vector<8x128xf32> to vector<8x128xbf16>
    %c0_49 = arith.constant 0 : index
    %c0_50 = arith.constant 0 : index
    %161 = vector.load %arg5[%c0_49, %c0_50] : memref<128x384xbf16, #tpu.memory_space<vmem>>, vector<128x384xbf16>
    %cst_51 = arith.constant dense<0.000000e+00> : vector<8x384xf32>
    %162 = tpu.matmul %160, %161, %cst_51 {dimension_numbers = #tpu.dot_dimension_numbers<[1], [0], [0], [1], [0, 0, 1, 1], [], []>} : vector<8x128xbf16>, vector<128x384xbf16>, vector<8x384xf32> -> vector<8x384xf32>
    %163 = arith.index_cast %159 : i32 to index
    %c0_52 = arith.constant 0 : index
    %164 = vector.load %arg12[%163, %c0_52] : memref<64x384xf32, #tpu.memory_space<vmem>>, vector<8x384xf32>
    %165 = vector.extract_strided_slice %164 {offsets = [0, 0], sizes = [8, 128], strides = [1, 1]} : vector<8x384xf32> to vector<8x128xf32>
    %166 = vector.extract_strided_slice %162 {offsets = [0, 0], sizes = [8, 128], strides = [1, 1]} : vector<8x384xf32> to vector<8x128xf32>
    %167 = arith.addf %165, %166 : vector<8x128xf32>
    %168 = arith.negf %167 : vector<8x128xf32>
    %169 = math.exp %168 : vector<8x128xf32>
    %cst_53 = arith.constant 1.000000e+00 : f32
    %170 = vector.broadcast %cst_53 : f32 to vector<8x128xf32>
    %171 = arith.addf %170, %169 : vector<8x128xf32>
    %172 = arith.divf %170, %171 : vector<8x128xf32>
    %173 = vector.extract_strided_slice %164 {offsets = [0, 128], sizes = [8, 128], strides = [1, 1]} : vector<8x384xf32> to vector<8x128xf32>
    %174 = vector.extract_strided_slice %162 {offsets = [0, 128], sizes = [8, 128], strides = [1, 1]} : vector<8x384xf32> to vector<8x128xf32>
    %175 = arith.addf %173, %174 : vector<8x128xf32>
    %176 = arith.negf %175 : vector<8x128xf32>
    %177 = math.exp %176 : vector<8x128xf32>
    %cst_54 = arith.constant 1.000000e+00 : f32
    %178 = vector.broadcast %cst_54 : f32 to vector<8x128xf32>
    %179 = arith.addf %178, %177 : vector<8x128xf32>
    %180 = arith.divf %178, %179 : vector<8x128xf32>
    %181 = vector.extract_strided_slice %164 {offsets = [0, 256], sizes = [8, 128], strides = [1, 1]} : vector<8x384xf32> to vector<8x128xf32>
    %182 = vector.extract_strided_slice %162 {offsets = [0, 256], sizes = [8, 128], strides = [1, 1]} : vector<8x384xf32> to vector<8x128xf32>
    %183 = arith.addf %182, %12 : vector<8x128xf32>
    %184 = arith.mulf %172, %183 : vector<8x128xf32>
    %185 = arith.addf %181, %184 : vector<8x128xf32>
    %186 = math.tanh %185 : vector<8x128xf32>
    %cst_55 = arith.constant 1.000000e+00 : f32
    %187 = vector.broadcast %cst_55 : f32 to vector<8x128xf32>
    %188 = arith.subf %187, %180 : vector<8x128xf32>
    %189 = arith.mulf %188, %186 : vector<8x128xf32>
    %190 = arith.mulf %180, %155 : vector<8x128xf32>
    %191 = arith.addf %189, %190 : vector<8x128xf32>
    %192 = arith.index_cast %159 : i32 to index
    %c0_56 = arith.constant 0 : index
    %193 = vector.load %arg13[%192, %c0_56] : memref<64x128xf32, #tpu.memory_space<vmem>>, vector<8x128xf32>
    tpu.vector_store %arg13[%192, %c0_56], %191 {strides = array<i32>} : memref<64x128xf32, #tpu.memory_space<vmem>>, vector<8x128xf32>,
    %c5_i32 = arith.constant 5 : i32
    %c8_i32_57 = arith.constant 8 : i32
    %194 = arith.muli %c5_i32, %c8_i32_57 : i32
    %195 = tpu.assume_multiple %194, 8 : i32
    %196 = arith.truncf %191 : vector<8x128xf32> to vector<8x128xbf16>
    %c0_58 = arith.constant 0 : index
    %c0_59 = arith.constant 0 : index
    %197 = vector.load %arg5[%c0_58, %c0_59] : memref<128x384xbf16, #tpu.memory_space<vmem>>, vector<128x384xbf16>
    %cst_60 = arith.constant dense<0.000000e+00> : vector<8x384xf32>
    %198 = tpu.matmul %196, %197, %cst_60 {dimension_numbers = #tpu.dot_dimension_numbers<[1], [0], [0], [1], [0, 0, 1, 1], [], []>} : vector<8x128xbf16>, vector<128x384xbf16>, vector<8x384xf32> -> vector<8x384xf32>
    %199 = arith.index_cast %195 : i32 to index
    %c0_61 = arith.constant 0 : index
    %200 = vector.load %arg12[%199, %c0_61] : memref<64x384xf32, #tpu.memory_space<vmem>>, vector<8x384xf32>
    %201 = vector.extract_strided_slice %200 {offsets = [0, 0], sizes = [8, 128], strides = [1, 1]} : vector<8x384xf32> to vector<8x128xf32>
    %202 = vector.extract_strided_slice %198 {offsets = [0, 0], sizes = [8, 128], strides = [1, 1]} : vector<8x384xf32> to vector<8x128xf32>
    %203 = arith.addf %201, %202 : vector<8x128xf32>
    %204 = arith.negf %203 : vector<8x128xf32>
    %205 = math.exp %204 : vector<8x128xf32>
    %cst_62 = arith.constant 1.000000e+00 : f32
    %206 = vector.broadcast %cst_62 : f32 to vector<8x128xf32>
    %207 = arith.addf %206, %205 : vector<8x128xf32>
    %208 = arith.divf %206, %207 : vector<8x128xf32>
    %209 = vector.extract_strided_slice %200 {offsets = [0, 128], sizes = [8, 128], strides = [1, 1]} : vector<8x384xf32> to vector<8x128xf32>
    %210 = vector.extract_strided_slice %198 {offsets = [0, 128], sizes = [8, 128], strides = [1, 1]} : vector<8x384xf32> to vector<8x128xf32>
    %211 = arith.addf %209, %210 : vector<8x128xf32>
    %212 = arith.negf %211 : vector<8x128xf32>
    %213 = math.exp %212 : vector<8x128xf32>
    %cst_63 = arith.constant 1.000000e+00 : f32
    %214 = vector.broadcast %cst_63 : f32 to vector<8x128xf32>
    %215 = arith.addf %214, %213 : vector<8x128xf32>
    %216 = arith.divf %214, %215 : vector<8x128xf32>
    %217 = vector.extract_strided_slice %200 {offsets = [0, 256], sizes = [8, 128], strides = [1, 1]} : vector<8x384xf32> to vector<8x128xf32>
    %218 = vector.extract_strided_slice %198 {offsets = [0, 256], sizes = [8, 128], strides = [1, 1]} : vector<8x384xf32> to vector<8x128xf32>
    %219 = arith.addf %218, %12 : vector<8x128xf32>
    %220 = arith.mulf %208, %219 : vector<8x128xf32>
    %221 = arith.addf %217, %220 : vector<8x128xf32>
    %222 = math.tanh %221 : vector<8x128xf32>
    %cst_64 = arith.constant 1.000000e+00 : f32
    %223 = vector.broadcast %cst_64 : f32 to vector<8x128xf32>
    %224 = arith.subf %223, %216 : vector<8x128xf32>
    %225 = arith.mulf %224, %222 : vector<8x128xf32>
    %226 = arith.mulf %216, %191 : vector<8x128xf32>
    %227 = arith.addf %225, %226 : vector<8x128xf32>
    %228 = arith.index_cast %195 : i32 to index
    %c0_65 = arith.constant 0 : index
    %229 = vector.load %arg13[%228, %c0_65] : memref<64x128xf32, #tpu.memory_space<vmem>>, vector<8x128xf32>
    tpu.vector_store %arg13[%228, %c0_65], %227 {strides = array<i32>} : memref<64x128xf32, #tpu.memory_space<vmem>>, vector<8x128xf32>,
    %c6_i32 = arith.constant 6 : i32
    %c8_i32_66 = arith.constant 8 : i32
    %230 = arith.muli %c6_i32, %c8_i32_66 : i32
    %231 = tpu.assume_multiple %230, 8 : i32
    %232 = arith.truncf %227 : vector<8x128xf32> to vector<8x128xbf16>
    %c0_67 = arith.constant 0 : index
    %c0_68 = arith.constant 0 : index
    %233 = vector.load %arg5[%c0_67, %c0_68] : memref<128x384xbf16, #tpu.memory_space<vmem>>, vector<128x384xbf16>
    %cst_69 = arith.constant dense<0.000000e+00> : vector<8x384xf32>
    %234 = tpu.matmul %232, %233, %cst_69 {dimension_numbers = #tpu.dot_dimension_numbers<[1], [0], [0], [1], [0, 0, 1, 1], [], []>} : vector<8x128xbf16>, vector<128x384xbf16>, vector<8x384xf32> -> vector<8x384xf32>
    %235 = arith.index_cast %231 : i32 to index
    %c0_70 = arith.constant 0 : index
    %236 = vector.load %arg12[%235, %c0_70] : memref<64x384xf32, #tpu.memory_space<vmem>>, vector<8x384xf32>
    %237 = vector.extract_strided_slice %236 {offsets = [0, 0], sizes = [8, 128], strides = [1, 1]} : vector<8x384xf32> to vector<8x128xf32>
    %238 = vector.extract_strided_slice %234 {offsets = [0, 0], sizes = [8, 128], strides = [1, 1]} : vector<8x384xf32> to vector<8x128xf32>
    %239 = arith.addf %237, %238 : vector<8x128xf32>
    %240 = arith.negf %239 : vector<8x128xf32>
    %241 = math.exp %240 : vector<8x128xf32>
    %cst_71 = arith.constant 1.000000e+00 : f32
    %242 = vector.broadcast %cst_71 : f32 to vector<8x128xf32>
    %243 = arith.addf %242, %241 : vector<8x128xf32>
    %244 = arith.divf %242, %243 : vector<8x128xf32>
    %245 = vector.extract_strided_slice %236 {offsets = [0, 128], sizes = [8, 128], strides = [1, 1]} : vector<8x384xf32> to vector<8x128xf32>
    %246 = vector.extract_strided_slice %234 {offsets = [0, 128], sizes = [8, 128], strides = [1, 1]} : vector<8x384xf32> to vector<8x128xf32>
    %247 = arith.addf %245, %246 : vector<8x128xf32>
    %248 = arith.negf %247 : vector<8x128xf32>
    %249 = math.exp %248 : vector<8x128xf32>
    %cst_72 = arith.constant 1.000000e+00 : f32
    %250 = vector.broadcast %cst_72 : f32 to vector<8x128xf32>
    %251 = arith.addf %250, %249 : vector<8x128xf32>
    %252 = arith.divf %250, %251 : vector<8x128xf32>
    %253 = vector.extract_strided_slice %236 {offsets = [0, 256], sizes = [8, 128], strides = [1, 1]} : vector<8x384xf32> to vector<8x128xf32>
    %254 = vector.extract_strided_slice %234 {offsets = [0, 256], sizes = [8, 128], strides = [1, 1]} : vector<8x384xf32> to vector<8x128xf32>
    %255 = arith.addf %254, %12 : vector<8x128xf32>
    %256 = arith.mulf %244, %255 : vector<8x128xf32>
    %257 = arith.addf %253, %256 : vector<8x128xf32>
    %258 = math.tanh %257 : vector<8x128xf32>
    %cst_73 = arith.constant 1.000000e+00 : f32
    %259 = vector.broadcast %cst_73 : f32 to vector<8x128xf32>
    %260 = arith.subf %259, %252 : vector<8x128xf32>
    %261 = arith.mulf %260, %258 : vector<8x128xf32>
    %262 = arith.mulf %252, %227 : vector<8x128xf32>
    %263 = arith.addf %261, %262 : vector<8x128xf32>
    %264 = arith.index_cast %231 : i32 to index
    %c0_74 = arith.constant 0 : index
    %265 = vector.load %arg13[%264, %c0_74] : memref<64x128xf32, #tpu.memory_space<vmem>>, vector<8x128xf32>
    tpu.vector_store %arg13[%264, %c0_74], %263 {strides = array<i32>} : memref<64x128xf32, #tpu.memory_space<vmem>>, vector<8x128xf32>,
    %c7_i32 = arith.constant 7 : i32
    %c8_i32_75 = arith.constant 8 : i32
    %266 = arith.muli %c7_i32, %c8_i32_75 : i32
    %267 = tpu.assume_multiple %266, 8 : i32
    %268 = arith.truncf %263 : vector<8x128xf32> to vector<8x128xbf16>
    %c0_76 = arith.constant 0 : index
    %c0_77 = arith.constant 0 : index
    %269 = vector.load %arg5[%c0_76, %c0_77] : memref<128x384xbf16, #tpu.memory_space<vmem>>, vector<128x384xbf16>
    %cst_78 = arith.constant dense<0.000000e+00> : vector<8x384xf32>
    %270 = tpu.matmul %268, %269, %cst_78 {dimension_numbers = #tpu.dot_dimension_numbers<[1], [0], [0], [1], [0, 0, 1, 1], [], []>} : vector<8x128xbf16>, vector<128x384xbf16>, vector<8x384xf32> -> vector<8x384xf32>
    %271 = arith.index_cast %267 : i32 to index
    %c0_79 = arith.constant 0 : index
    %272 = vector.load %arg12[%271, %c0_79] : memref<64x384xf32, #tpu.memory_space<vmem>>, vector<8x384xf32>
    %273 = vector.extract_strided_slice %272 {offsets = [0, 0], sizes = [8, 128], strides = [1, 1]} : vector<8x384xf32> to vector<8x128xf32>
    %274 = vector.extract_strided_slice %270 {offsets = [0, 0], sizes = [8, 128], strides = [1, 1]} : vector<8x384xf32> to vector<8x128xf32>
    %275 = arith.addf %273, %274 : vector<8x128xf32>
    %276 = arith.negf %275 : vector<8x128xf32>
    %277 = math.exp %276 : vector<8x128xf32>
    %cst_80 = arith.constant 1.000000e+00 : f32
    %278 = vector.broadcast %cst_80 : f32 to vector<8x128xf32>
    %279 = arith.addf %278, %277 : vector<8x128xf32>
    %280 = arith.divf %278, %279 : vector<8x128xf32>
    %281 = vector.extract_strided_slice %272 {offsets = [0, 128], sizes = [8, 128], strides = [1, 1]} : vector<8x384xf32> to vector<8x128xf32>
    %282 = vector.extract_strided_slice %270 {offsets = [0, 128], sizes = [8, 128], strides = [1, 1]} : vector<8x384xf32> to vector<8x128xf32>
    %283 = arith.addf %281, %282 : vector<8x128xf32>
    %284 = arith.negf %283 : vector<8x128xf32>
    %285 = math.exp %284 : vector<8x128xf32>
    %cst_81 = arith.constant 1.000000e+00 : f32
    %286 = vector.broadcast %cst_81 : f32 to vector<8x128xf32>
    %287 = arith.addf %286, %285 : vector<8x128xf32>
    %288 = arith.divf %286, %287 : vector<8x128xf32>
    %289 = vector.extract_strided_slice %272 {offsets = [0, 256], sizes = [8, 128], strides = [1, 1]} : vector<8x384xf32> to vector<8x128xf32>
    %290 = vector.extract_strided_slice %270 {offsets = [0, 256], sizes = [8, 128], strides = [1, 1]} : vector<8x384xf32> to vector<8x128xf32>
    %291 = arith.addf %290, %12 : vector<8x128xf32>
    %292 = arith.mulf %280, %291 : vector<8x128xf32>
    %293 = arith.addf %289, %292 : vector<8x128xf32>
    %294 = math.tanh %293 : vector<8x128xf32>
    %cst_82 = arith.constant 1.000000e+00 : f32
    %295 = vector.broadcast %cst_82 : f32 to vector<8x128xf32>
    %296 = arith.subf %295, %288 : vector<8x128xf32>
    %297 = arith.mulf %296, %294 : vector<8x128xf32>
    %298 = arith.mulf %288, %263 : vector<8x128xf32>
    %299 = arith.addf %297, %298 : vector<8x128xf32>
    %300 = arith.index_cast %267 : i32 to index
    %c0_83 = arith.constant 0 : index
    %301 = vector.load %arg13[%300, %c0_83] : memref<64x128xf32, #tpu.memory_space<vmem>>, vector<8x128xf32>
    tpu.vector_store %arg13[%300, %c0_83], %299 {strides = array<i32>} : memref<64x128xf32, #tpu.memory_space<vmem>>, vector<8x128xf32>,
    %c8_i32_84 = arith.constant 8 : i32
    %c0_85 = arith.constant 0 : index
    %c0_86 = arith.constant 0 : index
    %302 = vector.load %arg11[%c0_85, %c0_86] : memref<8x128xf32, #tpu.memory_space<vmem>>, vector<8x128xf32>
    tpu.vector_store %arg11[%c0_85, %c0_86], %299 {strides = array<i32>} : memref<8x128xf32, #tpu.memory_space<vmem>>, vector<8x128xf32>,
    %c0_87 = arith.constant 0 : index
    %c0_88 = arith.constant 0 : index
    %303 = vector.load %arg13[%c0_87, %c0_88] : memref<64x128xf32, #tpu.memory_space<vmem>>, vector<64x128xf32>
    %304 = arith.truncf %303 : vector<64x128xf32> to vector<64x128xbf16>
    %c0_89 = arith.constant 0 : index
    %c0_90 = arith.constant 0 : index
    %305 = vector.load %arg7[%c0_89, %c0_90] : memref<128x128xbf16, #tpu.memory_space<vmem>>, vector<128x128xbf16>
    %cst_91 = arith.constant dense<0.000000e+00> : vector<64x128xf32>
    %306 = tpu.matmul %304, %305, %cst_91 {dimension_numbers = #tpu.dot_dimension_numbers<[1], [0], [0], [1], [0, 0, 1, 1], [], []>} : vector<64x128xbf16>, vector<128x128xbf16>, vector<64x128xf32> -> vector<64x128xf32>
    %c0_92 = arith.constant 0 : index
    %c0_93 = arith.constant 0 : index
    %307 = vector.load %arg8[%c0_92, %c0_93] : memref<1x128xf32, #tpu.memory_space<vmem>>, vector<1x128xf32>
    %308 = vector.broadcast %307 : vector<1x128xf32> to vector<64x128xf32>
    %309 = arith.addf %306, %308 : vector<64x128xf32>
    %c0_94 = arith.constant 0 : index
    %c0_95 = arith.constant 0 : index
    %310 = vector.load %arg9[%c0_94, %c0_95] : memref<64x128xf32, #tpu.memory_space<vmem>>, vector<64x128xf32>
    tpu.vector_store %arg9[%c0_94, %c0_95], %309 {strides = array<i32>} : memref<64x128xf32, #tpu.memory_space<vmem>>, vector<64x128xf32>,
    %c0_96 = arith.constant 0 : index
    %c0_97 = arith.constant 0 : index
    %311 = vector.load %arg13[%c0_96, %c0_97] : memref<64x128xf32, #tpu.memory_space<vmem>>, vector<64x128xf32>
    %c0_98 = arith.constant 0 : index
    %c0_99 = arith.constant 0 : index
    %312 = vector.load %arg10[%c0_98, %c0_99] : memref<64x128xf32, #tpu.memory_space<vmem>>, vector<64x128xf32>
    tpu.vector_store %arg10[%c0_98, %c0_99], %311 {strides = array<i32>} : memref<64x128xf32, #tpu.memory_space<vmem>>, vector<64x128xf32>,
    return
  }
  func.func @transform_0(%arg0: i32) -> (i32, i32) {
    %c0_i32 = arith.constant 0 : i32
    %c0_i32_0 = arith.constant 0 : i32
    return %arg0, %c0_i32 : i32, i32
  }
  func.func @transform_1(%arg0: i32) -> (i32, i32) {
    %c0_i32 = arith.constant 0 : i32
    %c0_i32_0 = arith.constant 0 : i32
    %c0_i32_1 = arith.constant 0 : i32
    return %c0_i32, %c0_i32_0 : i32, i32
  }
  func.func @transform_2(%arg0: i32) -> (i32, i32) {
    %c0_i32 = arith.constant 0 : i32
    %c0_i32_0 = arith.constant 0 : i32
    %c0_i32_1 = arith.constant 0 : i32
    return %c0_i32, %c0_i32_0 : i32, i32
  }
  func.func @transform_3(%arg0: i32) -> (i32, i32) {
    %c0_i32 = arith.constant 0 : i32
    %c0_i32_0 = arith.constant 0 : i32
    %c0_i32_1 = arith.constant 0 : i32
    return %c0_i32, %c0_i32_0 : i32, i32
  }
  func.func @transform_4(%arg0: i32) -> (i32, i32) {
    %c0_i32 = arith.constant 0 : i32
    %c0_i32_0 = arith.constant 0 : i32
    %c0_i32_1 = arith.constant 0 : i32
    return %c0_i32, %c0_i32_0 : i32, i32
  }
  func.func @transform_5(%arg0: i32) -> (i32, i32) {
    %c0_i32 = arith.constant 0 : i32
    %c0_i32_0 = arith.constant 0 : i32
    %c0_i32_1 = arith.constant 0 : i32
    return %c0_i32, %c0_i32_0 : i32, i32
  }
  func.func @transform_6(%arg0: i32) -> (i32, i32) {
    %c0_i32 = arith.constant 0 : i32
    %c0_i32_0 = arith.constant 0 : i32
    %c0_i32_1 = arith.constant 0 : i32
    return %c0_i32, %c0_i32_0 : i32, i32
  }
  func.func @transform_7(%arg0: i32) -> (i32, i32) {
    %c0_i32 = arith.constant 0 : i32
    %c0_i32_0 = arith.constant 0 : i32
    %c0_i32_1 = arith.constant 0 : i32
    return %c0_i32, %c0_i32_0 : i32, i32
  }
  func.func @transform_8(%arg0: i32) -> (i32, i32) {
    %c0_i32 = arith.constant 0 : i32
    %c0_i32_0 = arith.constant 0 : i32
    return %arg0, %c0_i32 : i32, i32
  }
  func.func @transform_9(%arg0: i32) -> (i32, i32) {
    %c0_i32 = arith.constant 0 : i32
    %c0_i32_0 = arith.constant 0 : i32
    return %arg0, %c0_i32 : i32, i32
  }
}

</mosaic_0001>

<bundles_post_ra>
// kernel: rnn_net_forward.1
= control target key start
LH: loop header
LB: loop body
LE: loop exit
PB: predicated region body
PF: predicated region fallthrough
CT: control target
= control target key end

     0   :  { %v49_v0 = vlaneseq  ;;  %v3382_v2 = vmov 1983009808   ;;  %vm101_vm0 = vcmask 31744   ;;  %v3383_v8 = vmov 0   ;;  %s4283_s2 = inlined_call_operand.vmem [shape: bf16[4,384], index: 2, kind: input, shape index: {}]   ;;  %s4284_s0 = inlined_call_operand.vmem [shape: bf16[64,4], index: 0, kind: input, shape index: {}]   ;;  %s4285_s4 = inlined_call_operand.vmem [shape: bf16[128,384], index: 4, kind: input, shape index: {}]   ;;  %s4286_s1 = inlined_call_operand.vmem [shape: f32[8,128], index: 1, kind: input, shape index: {}]   ;;  %s4287_s3 = inlined_call_operand.vmem [shape: f32[1,384], index: 3, kind: input, shape index: {}]   ;;  %s4288_s5 = inlined_call_operand.vmem [shape: f32[1,128], index: 5, kind: input, shape index: {}]   ;;  %s4289_s9 = inlined_call_operand.vmem [shape: f32[64,128], index: 9, kind: output, shape index: {1}]   ;;  %s4290_s6 = inlined_call_operand.vmem [shape: bf16[128,128], index: 6, kind: input, shape index: {}]   ;;  %s4291_s7 = inlined_call_operand.vmem [shape: f32[1,128], index: 7, kind: input, shape index: {}]   ;;  %s4292_s8 = inlined_call_operand.vmem [shape: f32[64,128], index: 8, kind: output, shape index: {0}]  }
   0x1   :  { %v46_v1 = vld [vmem:[%s4283_s2] sm:$0x3f]  ;;  %v87_v3 = vunpack.c.l.s4 %v3382_v2  ;;  %156 = vmatprep.mubr.bf16.mxu0 %v3383_v8  ;;  %vm114_vm1 = vcmask 1041408   ;;  %v3450_v11 = vld [vmem:[%s4285_s4 + $0xac] ss:$12 sps:$4 sm:$0xff]   ;;  %v3194_v19 = vld [vmem:[%s4284_s0 + $0x10] sm:$0xff]  }
   0x2   :  { %v3439_v4 = vshrl.u32 %v49_v0, 7  ;;  %v3177_v5 = vld [vmem:[%s4284_s0] sm:$0xff]   ;;  %v85_v6 = vcombine.high %v46_v1, %v46_v1  ;;  %v3178_v14 = vld [vmem:[%s4284_s0 + $0x8] sm:$0xff]   ;;  %v3475_v20 = vld [vmem:[%s4285_s4 + $0x90] ss:$12 sps:$4 sm:$0xff]   ;;  %v3384_v37 = vmov 0.0  }
   0x3   :  { %v88_v7 = vunpack.c.0.s8 %v87_v3  ;;  %2979 = vmatprep.mubr.msk.bf16.mxu1 %vm101_vm0, %v3177_v5  ;;  %v3458_v17 = vld [vmem:[%s4285_s4 + $0xa8] ss:$12 sps:$4 sm:$0xff]   ;;  %v3195_v22 = vld [vmem:[%s4284_s0 + $0x18] sm:$0xff]   ;;  %v3501_v24 = vld [vmem:[%s4285_s4 + $0x64] ss:$12 sps:$4 sm:$0xff]   ;;  %vm3385_vm2 = vmmov 0  }
   0x4   :  { %v3463_v18 = vld [vmem:[%s4285_s4 + $0x94] ss:$12 sps:$4 sm:$0xff]   ;;  %v3482_v21 = vld [vmem:[%s4285_s4 + $0x7c] ss:$12 sps:$4 sm:$0xff]   ;;  %v3495_v23 = vld [vmem:[%s4285_s4 + $0x78] ss:$12 sps:$4 sm:$0xff]  }
   0x5   :  { %v91_v9 = vsub.s32 %v88_v7, %v3439_v4  ;;  %v3510_v25 = vld [vmem:[%s4285_s4 + $0x60] ss:$12 sps:$4 sm:$0xff]   ;;  %v3523_v27 = vld [vmem:[%s4285_s4 + $0x48] ss:$12 sps:$4 sm:$0xff]   ;;  %v3538_v29 = vld [vmem:[%s4285_s4 + $0x30] ss:$12 sps:$4 sm:$0xff]  }
   0x6   :  { %v3517_v26 = vld [vmem:[%s4285_s4 + $0x4c] ss:$12 sps:$4 sm:$0xff]   ;;  %v3530_v28 = vld [vmem:[%s4285_s4 + $0x34] ss:$12 sps:$4 sm:$0xff]   ;;  %v3544_v30 = vld [vmem:[%s4285_s4 + $0x1c] ss:$12 sps:$4 sm:$0xff]  }
   0x7   :  { %v99_v10 = vrot.slane %v85_v6, %v91_v9  ;;  %v92_v12 = vrot.slane %v46_v1, %v91_v9  ;;  %v3553_v31 = vld [vmem:[%s4285_s4 + $0x18] ss:$12 sps:$4 sm:$0xff]   ;;  %v3568_v33 = vld [vmem:[%s4285_s4] ss:$12 sps:$4 sm:$0xff]   ;;  %v3205_v35 = vld [vmem:[%s4285_s4 + $0xb0] ss:$12 sps:$4 sm:$0xff]  }
   0x8   :  { %v3560_v32 = vld [vmem:[%s4285_s4 + $0x4] ss:$12 sps:$4 sm:$0xff]   ;;  %v3207_v39 = vld [vmem:[%s4285_s4 + $0x80] ss:$12 sps:$4 sm:$0xff]   ;;  %v3208_v40 = vld [vmem:[%s4285_s4 + $0x68] ss:$12 sps:$4 sm:$0xff]  }
   0x9   :  { %3171 = vmatprep.subr.msk.bf16.mxu1 %vm114_vm1, %v99_v10  ;;  %v122_v13 = vsel %vm114_vm1, %v99_v10, 0  ;;  %v100_v15 = vcombine.high %v92_v12, %v92_v12  ;;  %v116_v16 = vsel %vm114_vm1, %v92_v12, 0  ;;  %v3573_v34 = vld [vmem:[%s4286_s1] sm:$0xff]  ;;  %v3209_v41 = vld [vmem:[%s4285_s4 + $0x50] ss:$12 sps:$4 sm:$0xff]   ;;  %v59_v53 = vsub.s32 2, %v3439_v4 }
   0xa   :  { %2978 = vmatpush3.bf16.msra.mxu1 %v122_v13  ;;  %v294_v36 = vpack.c.bf16 %v3573_v34, %v3573_v34  ;;  %v3206_v38 = vld [vmem:[%s4285_s4 + $0x98] ss:$12 sps:$4 sm:$0xff]   ;;  %v3211_v43 = vld [vmem:[%s4285_s4 + $0x20] ss:$12 sps:$4 sm:$0xff]   ;;  %v3212_v44 = vld [vmem:[%s4285_s4 + $0x8] ss:$12 sps:$4 sm:$0xff]  }
   0xb   :  { %455 = vmatprep.subr.bf16.mxu1 %v3450_v11  ;;  %2661 = vmatprep.subr.msk.bf16.mxu0 %vm114_vm1, %v100_v15  ;;  %v3210_v42 = vld [vmem:[%s4285_s4 + $0x38] ss:$12 sps:$4 sm:$0xff]   ;;  %v3213_v45 = vld [vmem:[%s4285_s4 + $0xb0] ss:$12 sps:$4 sm:$0xff]   ;;  %v3215_v47 = vld [vmem:[%s4285_s4 + $0x80] ss:$12 sps:$4 sm:$0xff]  }
   0xc   :  { %139 = vmatpush1.bf16.msra.mxu0 %v116_v16  ;;  %v3214_v46 = vld [vmem:[%s4285_s4 + $0x98] ss:$12 sps:$4 sm:$0xff]   ;;  %v3216_v48 = vld [vmem:[%s4285_s4 + $0x68] ss:$12 sps:$4 sm:$0xff]   ;;  %v3217_v49 = vld [vmem:[%s4285_s4 + $0x50] ss:$12 sps:$4 sm:$0xff]  }
   0xd   :  { %2980 = vmatmul.mubr.msk.bf16.vlgmr.msra.gmra.mxu1 %vm101_vm0, %v3178_v14  ;;  %726 = vmatprep.subr.bf16.mxu0 %v3450_v11  ;;  %v3218_v50 = vld [vmem:[%s4285_s4 + $0x38] ss:$12 sps:$4 sm:$0xff]   ;;  %v3219_v51 = vld [vmem:[%s4285_s4 + $0x20] ss:$12 sps:$4 sm:$0xff]   ;;  %v3220_v52 = vld [vmem:[%s4285_s4 + $0x8] ss:$12 sps:$4 sm:$0xff]  }
   0xe   :  { %456 = vmatpush1.bf16.msra.mxu1 %v3458_v17  ;;  %2983 = vmatprep.mubr.msk.bf16.mxu1 %vm101_vm0, %v3194_v19  ;;  %v47_v54 = vld [vmem:[%s4287_s3] sm:$0x7]  ;;  %v51_v62 = vsub.s32 0, %v3439_v4  ;;  %v55_v2 = vsub.s32 1, %v3439_v4 }
   0xf   :  { %457 = vmatprep.subr.bf16.mxu1 %v3463_v18  ;;  %2662 = vmatmul.mubr.msk.bf16.vlgmr.msra.gmra.mxu0 %vm101_vm0, %v3177_v5  ;;  %v3661_v55 = vrot.slane %v47_v54, %v59_v53 }
  0x10   :  { %727 = vmatpush1.bf16.msra.mxu0 %v3458_v17  ;;  %166 = vmatprep.mubr.bf16.mxu0 %v3383_v8  ;;  %v3680_v7 = vrot.slane %v47_v54, %v51_v62  ;;  %v3685_v13 = vrot.slane %v47_v54, %v55_v2 }
  0x11   :  { %728 = vmatprep.subr.bf16.mxu0 %v3463_v18 }
  0x12   :  { %458 = vmatpush1.bf16.msra.mxu1 %v3475_v20 }
  0x13   :  { %459 = vmatprep.subr.bf16.mxu1 %v3482_v21 }
  0x14   :  { %729 = vmatpush1.bf16.msra.mxu0 %v3475_v20 }
  0x15   :  { %2984 = vmatmul.mubr.msk.bf16.gmra.mxu1 %vm101_vm0, %v3195_v22  ;;  %730 = vmatprep.subr.bf16.mxu0 %v3482_v21 }
  0x16   :  { %460 = vmatpush1.bf16.msra.mxu1 %v3495_v23  ;;  %487 = vmatprep.mubr.bf16.mxu1 %v3383_v8 }
  0x17   :  { %461 = vmatprep.subr.bf16.mxu1 %v3501_v24  ;;  %2663 = vmatmul.mubr.msk.bf16.gmra.mxu0 %vm101_vm0, %v3178_v14 }
  0x18   :  { %731 = vmatpush1.bf16.msra.mxu0 %v3495_v23  ;;  %176 = vmatprep.mubr.bf16.mxu0 %v3383_v8 }
  0x19   :  { %732 = vmatprep.subr.bf16.mxu0 %v3501_v24 }
  0x1a   :  { %462 = vmatpush1.bf16.msra.mxu1 %v3510_v25 }
  0x1b   :  { %463 = vmatprep.subr.bf16.mxu1 %v3517_v26 }
  0x1c   :  { %733 = vmatpush1.bf16.msra.mxu0 %v3510_v25 }
  0x1d   :  { %734 = vmatprep.subr.bf16.mxu0 %v3517_v26 }
  0x1e   :  { %464 = vmatpush1.bf16.msra.mxu1 %v3523_v27 }
  0x1f   :  { %465 = vmatprep.subr.bf16.mxu1 %v3530_v28  ;;  %2664 = vmatmul.mubr.msk.bf16.gmra.mxu0 %vm101_vm0, %v3194_v19 }
  0x20   :  { %735 = vmatpush1.bf16.msra.mxu0 %v3523_v27  ;;  %186 = vmatprep.mubr.bf16.mxu0 %v3383_v8 }
  0x21   :  { %736 = vmatprep.subr.bf16.mxu0 %v3530_v28 }
  0x22   :  { %466 = vmatpush1.bf16.msra.mxu1 %v3538_v29 }
  0x23   :  { %467 = vmatprep.subr.bf16.mxu1 %v3544_v30 }
  0x24   :  { %737 = vmatpush1.bf16.msra.mxu0 %v3538_v29 }
  0x25   :  { %738 = vmatprep.subr.bf16.mxu0 %v3544_v30 }
  0x26   :  { %468 = vmatpush1.bf16.msra.mxu1 %v3553_v31 }
  0x27   :  { %469 = vmatprep.subr.bf16.mxu1 %v3560_v32  ;;  %2665 = vmatmul.mubr.msk.bf16.gmra.mxu0 %vm101_vm0, %v3195_v22 }
  0x28   :  { %739 = vmatpush1.bf16.msra.mxu0 %v3553_v31  ;;  %758 = vmatprep.mubr.bf16.mxu0 %v3383_v8 }
  0x29   :  { %740 = vmatprep.subr.bf16.mxu0 %v3560_v32 }
  0x2a   :  { %470 = vmatpush1.bf16.msra.mxu1 %v3568_v33 }
  0x2b   :  { %2987 = vmatprep.subr.bf16.mxu1 %v3384_v37 }
  0x2c   :  { %741 = vmatpush1.bf16.msra.mxu0 %v3568_v33 }
  0x2d   :  { %488 = vmatmul.mubr.bf16.vlgmr.msra.gmra.mxu1 %v294_v36  ;;  %998 = vmatprep.subr.bf16.mxu0 %v3450_v11 }
  0x2e   :  { %2988 = vmatpush3.bf16.msra.mxu1 %v3205_v35  ;;  %3003 = vmatprep.mubr.msk.bf16.mxu1 %vm3385_vm2, %v3384_v37 }
  0x2f   :  { %2989 = vmatprep.subr.bf16.mxu1 %v3384_v37 }
  0x32   :  { %2990 = vmatpush3.bf16.msra.mxu1 %v3206_v38 }
  0x33   :  { %2991 = vmatprep.subr.bf16.mxu1 %v3384_v37 }
  0x36   :  { %2992 = vmatpush3.bf16.msra.mxu1 %v3207_v39 }
  0x37   :  { %2993 = vmatprep.subr.bf16.mxu1 %v3384_v37 }
  0x3a   :  { %2994 = vmatpush3.bf16.msra.mxu1 %v3208_v40 }
  0x3b   :  { %2995 = vmatprep.subr.bf16.mxu1 %v3384_v37 }
  0x3e   :  { %2996 = vmatpush3.bf16.msra.mxu1 %v3209_v41 }
  0x3f   :  { %2997 = vmatprep.subr.bf16.mxu1 %v3384_v37 }
  0x42   :  { %2998 = vmatpush3.bf16.msra.mxu1 %v3210_v42 }
  0x43   :  { %2999 = vmatprep.subr.bf16.mxu1 %v3384_v37 }
  0x46   :  { %3000 = vmatpush3.bf16.msra.mxu1 %v3211_v43 }
  0x47   :  { %3001 = vmatprep.subr.bf16.mxu1 %v3384_v37 }
  0x4a   :  { %3002 = vmatpush3.bf16.msra.mxu1 %v3212_v44 }
  0x4b   :  { %3007 = vmatprep.subr.bf16.mxu1 %v3384_v37 }
  0x4d   :  { %3004 = vmatmul.mubr.bf16.vlgmr.msra.gmra.mxu1 %v294_v36 }
  0x4e   :  { %3023 = vmatprep.mubr.msk.bf16.mxu1 %vm3385_vm2, %v3384_v37  ;;  %3008 = vmatpush3.bf16.msra.mxu1 %v3213_v45 }
  0x4f   :  { %3009 = vmatprep.subr.bf16.mxu1 %v3384_v37 }
  0x52   :  { %3010 = vmatpush3.bf16.msra.mxu1 %v3214_v46 }
  0x53   :  { %3011 = vmatprep.subr.bf16.mxu1 %v3384_v37 }
  0x56   :  { %3012 = vmatpush3.bf16.msra.mxu1 %v3215_v47 }
  0x57   :  { %3013 = vmatprep.subr.bf16.mxu1 %v3384_v37 }
  0x5a   :  { %3014 = vmatpush3.bf16.msra.mxu1 %v3216_v48 }
  0x5b   :  { %3015 = vmatprep.subr.bf16.mxu1 %v3384_v37 }
  0x5e   :  { %3016 = vmatpush3.bf16.msra.mxu1 %v3217_v49 }
  0x5f   :  { %3017 = vmatprep.subr.bf16.mxu1 %v3384_v37 }
  0x62   :  { %3018 = vmatpush3.bf16.msra.mxu1 %v3218_v50 }
  0x63   :  { %3019 = vmatprep.subr.bf16.mxu1 %v3384_v37 }
  0x66   :  { %3020 = vmatpush3.bf16.msra.mxu1 %v3219_v51 }
  0x67   :  { %3021 = vmatprep.subr.bf16.mxu1 %v3384_v37 }
  0x6a   :  { %3022 = vmatpush3.bf16.msra.mxu1 %v3220_v52 }
  0x6b   :  { %3027 = vmatprep.subr.bf16.mxu1 %v3384_v37 }
  0xcd   :  { %v2981_v56 = vpop.f32.mrf.mxu1 }
  0xce   :  { %v3664_v57 = vadd.f32 %v2981_v56, %v3661_v55 }
  0xcf   :  { %v3666_v58 = vpop.f32.mrf.mxu1  ;;  %v158_v59 = vpop.f32.mrf.mxu0 }
  0xd0   :  { %v159_v53 = vadd.f32 %v158_v59, %v3680_v7 }
  0xd1   :  { %v2982_v60 = vpop.f32.mrf.mxu1  ;;  %v160_v61 = vpop.f32.mrf.mxu0 }
  0xd2   :  { %v3670_v63 = vadd.f32 %v2982_v60, %v3661_v55 }
  0xd3   :  { %v234_v0 = vpop.f32.mrf.mxu1  ;;  %v3672_v1 = vpop.f32.mrf.mxu0 }
  0xd4   :  { %v3676_v3 = vadd.f32 %v234_v0, %v3661_v55 }
  0xd5   :  { %v2985_v5 = vpop.f32.mrf.mxu1  ;;  %v3678_v6 = vpop.f32.mrf.mxu0 }
  0xd6   :  { %v3683_v9 = vadd.f32 %v2985_v5, %v3661_v55 }
  0xd7   :  { %v247_v10 = vpop.f32.mrf.mxu1  ;;  %v168_v12 = vpop.f32.mrf.mxu0 }
  0xd8   :  { %v3688_v14 = vadd.f32 %v247_v10, %v3661_v55  ;;  %v3691_v4 = vadd.f32 %v168_v12, %v3680_v7  ;;  %v161_v12 = vadd.f32 %v160_v61, %v3685_v13 }
  0xd9   :  { %v2986_v15 = vpop.f32.mrf.mxu1  ;;  %v170_v16 = vpop.f32.mrf.mxu0 }
  0xda   :  { %v3694_v19 = vadd.f32 %v2986_v15, %v3661_v55  ;;  %v3697_v22 = vadd.f32 %v170_v16, %v3685_v13 }
  0xdb   :  { %v250_v35 = vpop.f32.mrf.mxu1  ;;  %v172_v36 = vpop.f32.mrf.mxu0 }
  0xdc   :  { %v3700_v38 = vadd.f32 %v250_v35, %v3661_v55  ;;  %v3703_v39 = vadd.f32 %v172_v36, %v3680_v7 }
  0xdd   :  { %v174_v40 = vpop.f32.mrf.mxu0 }
  0xde   :  { %v3706_v41 = vadd.f32 %v174_v40, %v3685_v13 }
  0xdf   :  { %v178_v42 = vpop.f32.mrf.mxu0 }
  0xe0   :  { %v3709_v43 = vadd.f32 %v178_v42, %v3680_v7  ;;  %v3734_v42 = vld [vmem:[%s4288_s5] ss:$0 sm:$0xff] }
  0xe1   :  { %v180_v44 = vpop.f32.mrf.mxu0 }
  0xe2   :  { %v3712_v45 = vadd.f32 %v180_v44, %v3685_v13 }
  0xe3   :  { %v182_v46 = vpop.f32.mrf.mxu0 }
  0xe4   :  { %v3715_v47 = vadd.f32 %v182_v46, %v3680_v7 }
  0xe5   :  { %v184_v48 = vpop.f32.mrf.mxu0 }
  0xe6   :  { %v3718_v49 = vadd.f32 %v184_v48, %v3685_v13 }
  0xe7   :  { %v188_v50 = vpop.f32.mrf.mxu0 }
  0xe8   :  { %v3721_v51 = vadd.f32 %v188_v50, %v3680_v7 }
  0xe9   :  { %v190_v52 = vpop.f32.mrf.mxu0 }
  0xea   :  { %v3725_v54 = vadd.f32 %v190_v52, %v3685_v13  ;;  %v232_v52 = vadd.f32 %v3666_v58, %v3661_v55  ;;  %v3222_v55 = vld [vmem:[%s4285_s4 + $0x98] ss:$12 sps:$4 sm:$0xff]   ;;  %v3223_v58 = vld [vmem:[%s4285_s4 + $0x80] ss:$12 sps:$4 sm:$0xff]  }
  0xeb   :  { %v192_v56 = vpop.f32.mrf.mxu0 }
  0xec   :  { %v3728_v60 = vadd.f32 %v192_v56, %v3680_v7 }
  0xed   :  { %v489_v62 = vpop.f32.mrf.mxu1 }
  0xee   :  { %v542_v0 = vadd.f32 %v489_v62, %v159_v53 }
  0xef   :  { %v491_v2 = vpop.f32.mrf.mxu1 }
  0xf0   :  { %v2695_v5 = vmul.f32 -1.442695, %v542_v0  ;;  %v549_v16 = vadd.f32 %v491_v2, %v161_v12 }
  0xf1   :  { %v493_v10 = vpop.f32.mrf.mxu1 }
  0xf2   :  { %3301 = vpow2.f32 %v2695_v5  ;;  %v2696_v35 = vmul.f32 -1.442695, %v549_v16 }
  0xf3   :  { %v494_v15 = vpop.f32.mrf.mxu1 }
  0xf4   :  { %3303 = vpow2.f32 %v2696_v35 }
  0xff   :  { %v3302_v59 = vpop.eup %3301 }
 0x100   :  { %v546_v36 = vadd.f32 1.0, %v3302_v59  ;;  %v3225_v59 = vld [vmem:[%s4285_s4 + $0x50] ss:$12 sps:$4 sm:$0xff]  }
 0x101   :  { %v3304_v40 = vpop.eup %3303 }
 0x102   :  { %3305 = vrcp.f32 %v546_v36  ;;  %v553_v44 = vadd.f32 1.0, %v3304_v40  ;;  %v3226_v36 = vld [vmem:[%s4285_s4 + $0x38] ss:$12 sps:$4 sm:$0xff]   ;;  %v3227_v40 = vld [vmem:[%s4285_s4 + $0x20] ss:$12 sps:$4 sm:$0xff]  }
 0x104   :  { %3307 = vrcp.f32 %v553_v44  ;;  %v3228_v44 = vld [vmem:[%s4285_s4 + $0x8] ss:$12 sps:$4 sm:$0xff]  }
 0x10d   :  { %v530_v46 = vpop.f32.mrf.mxu1 }
 0x10e   :  { %v556_v48 = vadd.f32 %v3734_v42, %v530_v46  ;;  %v3799_v46 = vpop.f32.mrf.mxu0 }
 0x10f   :  { %v3306_v50 = vpop.eup %3305  ;;  %v3005_v61 = vpop.f32.mrf.mxu1 }
 0x110   :  { %v557_v53 = vmul.f32 %v3306_v50, %v556_v48  ;;  %v163_v48 = vadd.f32 %v3672_v1, %v3680_v7 }
 0x111   :  { %v533_v56 = vpop.f32.mrf.mxu1  ;;  %v3308_v2 = vpop.eup %3307 }
 0x112   :  { %v558_v62 = vadd.f32 %v557_v53, %v232_v52  ;;  %v560_v5 = vsub.f32 1.0, %v3308_v2  ;;  %v562_v12 = vmul.f32 %v3308_v2, %v3573_v34  ;;  %v3221_v34 = vld [vmem:[%s4285_s4 + $0xb0] ss:$12 sps:$4 sm:$0xff]  }
 0x113   :  { %v3006_v0 = vpop.f32.mrf.mxu1 }
 0x114   :  { %3309 = vtanh.f32 %v558_v62 }
 0x121   :  { %v3310_v10 = vpop.eup %3309 }
 0x122   :  { %v561_v15 = vmul.f32 %v3310_v10, %v560_v5  ;;  %v165_v5 = vadd.f32 %v3678_v6, %v3685_v13 }
 0x124   :  { %v3740_v16 = vadd.f32 %v562_v12, %v561_v15 }
 0x126   :  { %v565_v35 = vpack.c.bf16 %v3740_v16, %v3740_v16  ;;  %2634 = vst [vmem:[%s4289_s9] sm:$0xff] %v3740_v16 }
 0x128   :  { %759 = vmatmul.mubr.bf16.vlgmr.msra.gmra.mxu0 %v565_v35  ;;  %3024 = vmatmul.mubr.bf16.vlgmr.msra.gmra.mxu1 %v565_v35 }
 0x129   :  { %999 = vmatpush1.bf16.msra.mxu0 %v3458_v17  ;;  %1030 = vmatprep.mubr.bf16.mxu0 %v3383_v8 }
 0x12a   :  { %1000 = vmatprep.subr.bf16.mxu0 %v3463_v18  ;;  %3043 = vmatprep.mubr.msk.bf16.mxu1 %vm3385_vm2, %v3384_v37 }
 0x12b   :  { %3028 = vmatpush3.bf16.msra.mxu1 %v3221_v34 }
 0x12c   :  { %3029 = vmatprep.subr.bf16.mxu1 %v3384_v37 }
 0x12d   :  { %1001 = vmatpush1.bf16.msra.mxu0 %v3475_v20 }
 0x12e   :  { %1002 = vmatprep.subr.bf16.mxu0 %v3482_v21 }
 0x12f   :  { %3030 = vmatpush3.bf16.msra.mxu1 %v3222_v55 }
 0x130   :  { %3031 = vmatprep.subr.bf16.mxu1 %v3384_v37 }
 0x131   :  { %1003 = vmatpush1.bf16.msra.mxu0 %v3495_v23 }
 0x132   :  { %1004 = vmatprep.subr.bf16.mxu0 %v3501_v24 }
 0x133   :  { %3032 = vmatpush3.bf16.msra.mxu1 %v3223_v58 }
 0x134   :  { %3033 = vmatprep.subr.bf16.mxu1 %v3384_v37 }
 0x135   :  { %1005 = vmatpush1.bf16.msra.mxu0 %v3510_v25 }
 0x136   :  { %1006 = vmatprep.subr.bf16.mxu0 %v3517_v26 }
 0x139   :  { %1007 = vmatpush1.bf16.msra.mxu0 %v3523_v27 }
 0x13a   :  { %1008 = vmatprep.subr.bf16.mxu0 %v3530_v28 }
 0x13d   :  { %1009 = vmatpush1.bf16.msra.mxu0 %v3538_v29 }
 0x13e   :  { %1010 = vmatprep.subr.bf16.mxu0 %v3544_v30 }
 0x141   :  { %1011 = vmatpush1.bf16.msra.mxu0 %v3553_v31 }
 0x142   :  { %1012 = vmatprep.subr.bf16.mxu0 %v3560_v32 }
 0x145   :  { %1013 = vmatpush1.bf16.msra.mxu0 %v3568_v33 }
 0x146   :  { %1270 = vmatprep.subr.bf16.mxu0 %v3450_v11  ;;  %v3224_v11 = vld [vmem:[%s4285_s4 + $0x68] ss:$12 sps:$4 sm:$0xff]  }
 0x147   :  { %3034 = vmatpush3.bf16.msra.mxu1 %v3224_v11 }
 0x148   :  { %3035 = vmatprep.subr.bf16.mxu1 %v3384_v37 }
 0x14b   :  { %3036 = vmatpush3.bf16.msra.mxu1 %v3225_v59 }
 0x14c   :  { %3037 = vmatprep.subr.bf16.mxu1 %v3384_v37 }
 0x14f   :  { %3038 = vmatpush3.bf16.msra.mxu1 %v3226_v36 }
 0x150   :  { %3039 = vmatprep.subr.bf16.mxu1 %v3384_v37 }
 0x153   :  { %3040 = vmatpush3.bf16.msra.mxu1 %v3227_v40 }
 0x154   :  { %3041 = vmatprep.subr.bf16.mxu1 %v3384_v37 }
 0x157   :  { %3042 = vmatpush3.bf16.msra.mxu1 %v3228_v44 }
 0x158   :  { %3047 = vmatprep.subr.bf16.mxu1 %v3384_v37 }
 0x1e8   :  { %v760_v50 = vpop.f32.mrf.mxu0  ;;  %v801_v61 = vpop.f32.mrf.mxu1 }
 0x1e9   :  { %v813_v52 = vadd.f32 %v760_v50, %v163_v48  ;;  %v827_v58 = vadd.f32 %v3734_v42, %v801_v61 }
 0x1ea   :  { %v762_v53 = vpop.f32.mrf.mxu0  ;;  %v3025_v56 = vpop.f32.mrf.mxu1 }
 0x1eb   :  { %v2721_v62 = vmul.f32 -1.442695, %v813_v52  ;;  %v820_v15 = vadd.f32 %v762_v53, %v165_v5 }
 0x1ec   :  { %v764_v0 = vpop.f32.mrf.mxu0  ;;  %v804_v2 = vpop.f32.mrf.mxu1 }
 0x1ed   :  { %3311 = vpow2.f32 %v2721_v62  ;;  %v2722_v35 = vmul.f32 -1.442695, %v820_v15 }
 0x1ee   :  { %v765_v10 = vpop.f32.mrf.mxu0  ;;  %v3026_v12 = vpop.f32.mrf.mxu1 }
 0x1ef   :  { %3313 = vpow2.f32 %v2722_v35 }
 0x1fa   :  { %v3312_v34 = vpop.eup %3311 }
 0x1fb   :  { %v817_v55 = vadd.f32 1.0, %v3312_v34 }
 0x1fc   :  { %v3314_v1 = vpop.eup %3313 }
 0x1fd   :  { %3315 = vrcp.f32 %v817_v55  ;;  %v824_v7 = vadd.f32 1.0, %v3314_v1 }
 0x1ff   :  { %3317 = vrcp.f32 %v824_v7 }
 0x20a   :  { %v3316_v11 = vpop.eup %3315 }
 0x20b   :  { %v828_v59 = vmul.f32 %v3316_v11, %v827_v58 }
 0x20c   :  { %v3318_v6 = vpop.eup %3317 }
 0x20d   :  { %v829_v36 = vadd.f32 %v828_v59, %v3676_v3  ;;  %v831_v40 = vsub.f32 1.0, %v3318_v6  ;;  %v833_v50 = vmul.f32 %v3318_v6, %v3740_v16  ;;  %v3240_v6 = vld [vmem:[%s4285_s4 + $0xb0] ss:$12 sps:$4 sm:$0xff]  }
 0x20f   :  { %3319 = vtanh.f32 %v829_v36  ;;  %v3890_v36 = vld [vmem:[%s4285_s4 + $0xa8] ss:$12 sps:$4 sm:$0xff]  }
 0x21c   :  { %v3320_v44 = vpop.eup %3319 }
 0x21d   :  { %v832_v48 = vmul.f32 %v3320_v44, %v831_v40  ;;  %v3900_v40 = vld [vmem:[%s4285_s4 + $0x94] ss:$12 sps:$4 sm:$0xff]   ;;  %v3906_v44 = vld [vmem:[%s4285_s4 + $0x90] ss:$12 sps:$4 sm:$0xff]  }
 0x21f   :  { %v3808_v52 = vadd.f32 %v833_v50, %v832_v48  ;;  %v3244_v48 = vld [vmem:[%s4285_s4 + $0x98] ss:$12 sps:$4 sm:$0xff]   ;;  %v3916_v50 = vld [vmem:[%s4285_s4 + $0x7c] ss:$12 sps:$4 sm:$0xff]  }
 0x221   :  { %v837_v53 = vpack.c.bf16 %v3808_v52, %v3808_v52  ;;  %2635 = vst [vmem:[%s4289_s9 + $0x8] sm:$0xff] %v3808_v52 }
 0x223   :  { %1031 = vmatmul.mubr.bf16.vlgmr.msra.gmra.mxu0 %v837_v53  ;;  %3044 = vmatmul.mubr.bf16.vlgmr.msra.gmra.mxu1 %v837_v53  ;;  %v3922_v53 = vld [vmem:[%s4285_s4 + $0x78] ss:$12 sps:$4 sm:$0xff]  }
 0x224   :  { %1271 = vmatpush1.bf16.msra.mxu0 %v3458_v17  ;;  %1302 = vmatprep.mubr.bf16.mxu0 %v3383_v8  ;;  %v3229_v17 = vld [vmem:[%s4285_s4 + $0xb0] ss:$12 sps:$4 sm:$0xff]  }
 0x225   :  { %1272 = vmatprep.subr.bf16.mxu0 %v3463_v18  ;;  %3063 = vmatprep.mubr.msk.bf16.mxu1 %vm3385_vm2, %v3384_v37  ;;  %v3230_v18 = vld [vmem:[%s4285_s4 + $0x98] ss:$12 sps:$4 sm:$0xff]  }
 0x226   :  { %3048 = vmatpush3.bf16.msra.mxu1 %v3229_v17  ;;  %v3248_v17 = vld [vmem:[%s4285_s4 + $0x80] ss:$12 sps:$4 sm:$0xff]  }
 0x227   :  { %3049 = vmatprep.subr.bf16.mxu1 %v3384_v37 }
 0x228   :  { %1273 = vmatpush1.bf16.msra.mxu0 %v3475_v20  ;;  %v3231_v20 = vld [vmem:[%s4285_s4 + $0x80] ss:$12 sps:$4 sm:$0xff]  }
 0x229   :  { %1274 = vmatprep.subr.bf16.mxu0 %v3482_v21  ;;  %v3232_v21 = vld [vmem:[%s4285_s4 + $0x68] ss:$12 sps:$4 sm:$0xff]  }
 0x22a   :  { %3050 = vmatpush3.bf16.msra.mxu1 %v3230_v18  ;;  %v3932_v18 = vld [vmem:[%s4285_s4 + $0x64] ss:$12 sps:$4 sm:$0xff]  }
 0x22b   :  { %3051 = vmatprep.subr.bf16.mxu1 %v3384_v37 }
 0x22c   :  { %1275 = vmatpush1.bf16.msra.mxu0 %v3495_v23  ;;  %v3233_v23 = vld [vmem:[%s4285_s4 + $0x50] ss:$12 sps:$4 sm:$0xff]  }
 0x22d   :  { %1276 = vmatprep.subr.bf16.mxu0 %v3501_v24  ;;  %v3234_v24 = vld [vmem:[%s4285_s4 + $0x38] ss:$12 sps:$4 sm:$0xff]  }
 0x22e   :  { %3052 = vmatpush3.bf16.msra.mxu1 %v3231_v20  ;;  %v3938_v20 = vld [vmem:[%s4285_s4 + $0x60] ss:$12 sps:$4 sm:$0xff]  }
 0x22f   :  { %3053 = vmatprep.subr.bf16.mxu1 %v3384_v37 }
 0x230   :  { %1277 = vmatpush1.bf16.msra.mxu0 %v3510_v25  ;;  %v3235_v25 = vld [vmem:[%s4285_s4 + $0x20] ss:$12 sps:$4 sm:$0xff]  }
 0x231   :  { %1278 = vmatprep.subr.bf16.mxu0 %v3517_v26  ;;  %v3236_v26 = vld [vmem:[%s4285_s4 + $0x8] ss:$12 sps:$4 sm:$0xff]  }
 0x232   :  { %3054 = vmatpush3.bf16.msra.mxu1 %v3232_v21  ;;  %v3252_v21 = vld [vmem:[%s4285_s4 + $0x68] ss:$12 sps:$4 sm:$0xff]  }
 0x233   :  { %3055 = vmatprep.subr.bf16.mxu1 %v3384_v37 }
 0x234   :  { %1279 = vmatpush1.bf16.msra.mxu0 %v3523_v27 }
 0x235   :  { %1280 = vmatprep.subr.bf16.mxu0 %v3530_v28 }
 0x236   :  { %3056 = vmatpush3.bf16.msra.mxu1 %v3233_v23  ;;  %v3947_v23 = vld [vmem:[%s4285_s4 + $0x4c] ss:$12 sps:$4 sm:$0xff]  }
 0x237   :  { %3057 = vmatprep.subr.bf16.mxu1 %v3384_v37 }
 0x238   :  { %1281 = vmatpush1.bf16.msra.mxu0 %v3538_v29 }
 0x239   :  { %1282 = vmatprep.subr.bf16.mxu0 %v3544_v30 }
 0x23a   :  { %3058 = vmatpush3.bf16.msra.mxu1 %v3234_v24  ;;  %v3953_v24 = vld [vmem:[%s4285_s4 + $0x48] ss:$12 sps:$4 sm:$0xff]  }
 0x23b   :  { %3059 = vmatprep.subr.bf16.mxu1 %v3384_v37 }
 0x23c   :  { %1283 = vmatpush1.bf16.msra.mxu0 %v3553_v31 }
 0x23d   :  { %1284 = vmatprep.subr.bf16.mxu0 %v3560_v32 }
 0x23e   :  { %3060 = vmatpush3.bf16.msra.mxu1 %v3235_v25  ;;  %v3256_v25 = vld [vmem:[%s4285_s4 + $0x50] ss:$12 sps:$4 sm:$0xff]  }
 0x23f   :  { %3061 = vmatprep.subr.bf16.mxu1 %v3384_v37 }
 0x240   :  { %1285 = vmatpush1.bf16.msra.mxu0 %v3568_v33 }
 0x242   :  { %3062 = vmatpush3.bf16.msra.mxu1 %v3236_v26  ;;  %v3963_v26 = vld [vmem:[%s4285_s4 + $0x34] ss:$12 sps:$4 sm:$0xff]  }
 0x243   :  { %3067 = vmatprep.subr.bf16.mxu1 %v3384_v37 }
 0x2e3   :  { %v1032_v27 = vpop.f32.mrf.mxu0  ;;  %v1073_v28 = vpop.f32.mrf.mxu1 }
 0x2e4   :  { %v1085_v29 = vadd.f32 %v1032_v27, %v3691_v4  ;;  %v1099_v15 = vadd.f32 %v3734_v42, %v1073_v28  ;;  %v3969_v27 = vld [vmem:[%s4285_s4 + $0x30] ss:$12 sps:$4 sm:$0xff]   ;;  %v3260_v28 = vld [vmem:[%s4285_s4 + $0x38] ss:$12 sps:$4 sm:$0xff]  }
 0x2e5   :  { %v1034_v30 = vpop.f32.mrf.mxu0  ;;  %v3045_v31 = vpop.f32.mrf.mxu1 }
 0x2e6   :  { %v2747_v32 = vmul.f32 -1.442695, %v1085_v29  ;;  %v1092_v62 = vadd.f32 %v1034_v30, %v3697_v22  ;;  %v3979_v29 = vld [vmem:[%s4285_s4 + $0x1c] ss:$12 sps:$4 sm:$0xff]   ;;  %v3985_v30 = vld [vmem:[%s4285_s4 + $0x18] ss:$12 sps:$4 sm:$0xff]  }
 0x2e7   :  { %v1036_v33 = vpop.f32.mrf.mxu0  ;;  %v1076_v3 = vpop.f32.mrf.mxu1  ;;  %v3264_v31 = vld [vmem:[%s4285_s4 + $0x20] ss:$12 sps:$4 sm:$0xff]  }
 0x2e8   :  { %3321 = vpow2.f32 %v2747_v32  ;;  %v2748_v0 = vmul.f32 -1.442695, %v1092_v62  ;;  %v3995_v32 = vld [vmem:[%s4285_s4 + $0x4] ss:$12 sps:$4 sm:$0xff]   ;;  %v4001_v33 = vld [vmem:[%s4285_s4] ss:$12 sps:$4 sm:$0xff]  }
 0x2e9   :  { %v1037_v61 = vpop.f32.mrf.mxu0  ;;  %v3046_v56 = vpop.f32.mrf.mxu1  ;;  %v3268_v3 = vld [vmem:[%s4285_s4 + $0x8] ss:$12 sps:$4 sm:$0xff]  }
 0x2ea   :  { %3323 = vpow2.f32 %v2748_v0 }
 0x2f5   :  { %v3322_v2 = vpop.eup %3321 }
 0x2f6   :  { %v1089_v5 = vadd.f32 1.0, %v3322_v2 }
 0x2f7   :  { %v3324_v10 = vpop.eup %3323 }
 0x2f8   :  { %3325 = vrcp.f32 %v1089_v5  ;;  %v1096_v12 = vadd.f32 1.0, %v3324_v10 }
 0x2fa   :  { %3327 = vrcp.f32 %v1096_v12 }
 0x305   :  { %v3326_v4 = vpop.eup %3325 }
 0x306   :  { %v1100_v35 = vmul.f32 %v3326_v4, %v1099_v15 }
 0x307   :  { %v3328_v55 = vpop.eup %3327 }
 0x308   :  { %v1101_v34 = vadd.f32 %v1100_v35, %v3664_v57  ;;  %v1103_v1 = vsub.f32 1.0, %v3328_v55  ;;  %v1105_v22 = vmul.f32 %v3328_v55, %v3808_v52  ;;  %v3885_v57 = vld [vmem:[%s4285_s4 + $0xac] ss:$12 sps:$4 sm:$0xff]  }
 0x309   :  { %1542 = vmatprep.subr.bf16.mxu0 %v3885_v57 }
 0x30a   :  { %3329 = vtanh.f32 %v1101_v34 }
 0x317   :  { %v3330_v7 = vpop.eup %3329 }
 0x318   :  { %v1104_v58 = vmul.f32 %v3330_v7, %v1103_v1 }
 0x31a   :  { %v3871_v11 = vadd.f32 %v1105_v22, %v1104_v58 }
 0x31c   :  { %v1109_v59 = vpack.c.bf16 %v3871_v11, %v3871_v11  ;;  %2636 = vst [vmem:[%s4289_s9 + $0x10] sm:$0xff] %v3871_v11 }
 0x31e   :  { %1303 = vmatmul.mubr.bf16.vlgmr.msra.gmra.mxu0 %v1109_v59  ;;  %3064 = vmatmul.mubr.bf16.vlgmr.msra.gmra.mxu1 %v1109_v59 }
 0x31f   :  { %1574 = vmatprep.mubr.bf16.mxu0 %v3383_v8  ;;  %3083 = vmatprep.mubr.msk.bf16.mxu1 %vm3385_vm2, %v3384_v37 }
 0x320   :  { %1543 = vmatpush1.bf16.msra.mxu0 %v3890_v36  ;;  %3068 = vmatpush3.bf16.msra.mxu1 %v3240_v6 }
 0x321   :  { %3069 = vmatprep.subr.bf16.mxu1 %v3384_v37  ;;  %1544 = vmatprep.subr.bf16.mxu0 %v3900_v40 }
 0x324   :  { %1545 = vmatpush1.bf16.msra.mxu0 %v3906_v44  ;;  %3070 = vmatpush3.bf16.msra.mxu1 %v3244_v48 }
 0x325   :  { %3071 = vmatprep.subr.bf16.mxu1 %v3384_v37  ;;  %1546 = vmatprep.subr.bf16.mxu0 %v3916_v50 }
 0x328   :  { %1547 = vmatpush1.bf16.msra.mxu0 %v3922_v53  ;;  %3072 = vmatpush3.bf16.msra.mxu1 %v3248_v17 }
 0x329   :  { %3073 = vmatprep.subr.bf16.mxu1 %v3384_v37  ;;  %1548 = vmatprep.subr.bf16.mxu0 %v3932_v18 }
 0x32c   :  { %1549 = vmatpush1.bf16.msra.mxu0 %v3938_v20  ;;  %3074 = vmatpush3.bf16.msra.mxu1 %v3252_v21 }
 0x32d   :  { %1550 = vmatprep.subr.bf16.mxu0 %v3947_v23  ;;  %3075 = vmatprep.subr.bf16.mxu1 %v3384_v37 }
 0x330   :  { %1551 = vmatpush1.bf16.msra.mxu0 %v3953_v24  ;;  %3076 = vmatpush3.bf16.msra.mxu1 %v3256_v25 }
 0x331   :  { %1552 = vmatprep.subr.bf16.mxu0 %v3963_v26  ;;  %3077 = vmatprep.subr.bf16.mxu1 %v3384_v37 }
 0x334   :  { %1553 = vmatpush1.bf16.msra.mxu0 %v3969_v27  ;;  %3078 = vmatpush3.bf16.msra.mxu1 %v3260_v28 }
 0x335   :  { %1554 = vmatprep.subr.bf16.mxu0 %v3979_v29  ;;  %3079 = vmatprep.subr.bf16.mxu1 %v3384_v37 }
 0x338   :  { %1555 = vmatpush1.bf16.msra.mxu0 %v3985_v30  ;;  %3080 = vmatpush3.bf16.msra.mxu1 %v3264_v31 }
 0x339   :  { %1556 = vmatprep.subr.bf16.mxu0 %v3995_v32  ;;  %3081 = vmatprep.subr.bf16.mxu1 %v3384_v37 }
 0x33c   :  { %1557 = vmatpush1.bf16.msra.mxu0 %v4001_v33  ;;  %3082 = vmatpush3.bf16.msra.mxu1 %v3268_v3  ;;  %v3270_v3 = vld [vmem:[%s4285_s4 + $0x98] ss:$12 sps:$4 sm:$0xff]  }
 0x33d   :  { %1814 = vmatprep.subr.bf16.mxu0 %v3885_v57  ;;  %3087 = vmatprep.subr.bf16.mxu1 %v3384_v37 }
 0x3de   :  { %v1304_v61 = vpop.f32.mrf.mxu0  ;;  %v1345_v56 = vpop.f32.mrf.mxu1 }
 0x3df   :  { %v1357_v62 = vadd.f32 %v1304_v61, %v3703_v39  ;;  %v1371_v22 = vadd.f32 %v3734_v42, %v1345_v56  ;;  %v3271_v61 = vld [vmem:[%s4285_s4 + $0x80] ss:$12 sps:$4 sm:$0xff]   ;;  %v3272_v56 = vld [vmem:[%s4285_s4 + $0x68] ss:$12 sps:$4 sm:$0xff]  }
 0x3e0   :  { %v1306_v0 = vpop.f32.mrf.mxu0  ;;  %v3065_v2 = vpop.f32.mrf.mxu1 }
 0x3e1   :  { %v2773_v5 = vmul.f32 -1.442695, %v1357_v62  ;;  %v1364_v35 = vadd.f32 %v1306_v0, %v3706_v41  ;;  %v3273_v62 = vld [vmem:[%s4285_s4 + $0x50] ss:$12 sps:$4 sm:$0xff]   ;;  %v3274_v0 = vld [vmem:[%s4285_s4 + $0x38] ss:$12 sps:$4 sm:$0xff]  }
 0x3e2   :  { %v1308_v10 = vpop.f32.mrf.mxu0  ;;  %v1348_v12 = vpop.f32.mrf.mxu1  ;;  %v3275_v2 = vld [vmem:[%s4285_s4 + $0x20] ss:$12 sps:$4 sm:$0xff]  }
 0x3e3   :  { %3331 = vpow2.f32 %v2773_v5  ;;  %v2774_v34 = vmul.f32 -1.442695, %v1364_v35  ;;  %v3276_v5 = vld [vmem:[%s4285_s4 + $0x8] ss:$12 sps:$4 sm:$0xff]  }
 0x3e4   :  { %v1309_v15 = vpop.f32.mrf.mxu0  ;;  %v3066_v4 = vpop.f32.mrf.mxu1 }
 0x3e5   :  { %3333 = vpow2.f32 %v2774_v34 }
 0x3f0   :  { %v3332_v55 = vpop.eup %3331 }
 0x3f1   :  { %v1361_v1 = vadd.f32 1.0, %v3332_v55 }
 0x3f2   :  { %v3334_v7 = vpop.eup %3333 }
 0x3f3   :  { %3335 = vrcp.f32 %v1361_v1  ;;  %v1368_v58 = vadd.f32 1.0, %v3334_v7 }
 0x3f5   :  { %3337 = vrcp.f32 %v1368_v58 }
 0x400   :  { %v3336_v39 = vpop.eup %3335 }
 0x401   :  { %v1372_v59 = vmul.f32 %v3336_v39, %v1371_v22 }
 0x402   :  { %v3338_v48 = vpop.eup %3337 }
 0x403   :  { %v1373_v6 = vadd.f32 %v1372_v59, %v3670_v63  ;;  %v1375_v17 = vsub.f32 1.0, %v3338_v48  ;;  %v1377_v41 = vmul.f32 %v3338_v48, %v3871_v11  ;;  %v3269_v63 = vld [vmem:[%s4285_s4 + $0xb0] ss:$12 sps:$4 sm:$0xff]  }
 0x405   :  { %3339 = vtanh.f32 %v1373_v6 }
 0x412   :  { %v3340_v21 = vpop.eup %3339 }
 0x413   :  { %v1376_v25 = vmul.f32 %v3340_v21, %v1375_v17 }
 0x415   :  { %v4016_v28 = vadd.f32 %v1377_v41, %v1376_v25 }
 0x417   :  { %v1381_v31 = vpack.c.bf16 %v4016_v28, %v4016_v28  ;;  %2637 = vst [vmem:[%s4289_s9 + $0x18] sm:$0xff] %v4016_v28 }
 0x419   :  { %1575 = vmatmul.mubr.bf16.vlgmr.msra.gmra.mxu0 %v1381_v31  ;;  %3084 = vmatmul.mubr.bf16.vlgmr.msra.gmra.mxu1 %v1381_v31 }
 0x41a   :  { %1815 = vmatpush1.bf16.msra.mxu0 %v3890_v36  ;;  %1846 = vmatprep.mubr.bf16.mxu0 %v3383_v8 }
 0x41b   :  { %1816 = vmatprep.subr.bf16.mxu0 %v3900_v40  ;;  %3103 = vmatprep.mubr.msk.bf16.mxu1 %vm3385_vm2, %v3384_v37 }
 0x41c   :  { %3088 = vmatpush3.bf16.msra.mxu1 %v3269_v63 }
 0x41d   :  { %3089 = vmatprep.subr.bf16.mxu1 %v3384_v37 }
 0x41e   :  { %1817 = vmatpush1.bf16.msra.mxu0 %v3906_v44 }
 0x41f   :  { %1818 = vmatprep.subr.bf16.mxu0 %v3916_v50 }
 0x420   :  { %3090 = vmatpush3.bf16.msra.mxu1 %v3270_v3 }
 0x421   :  { %3091 = vmatprep.subr.bf16.mxu1 %v3384_v37 }
 0x422   :  { %1819 = vmatpush1.bf16.msra.mxu0 %v3922_v53 }
 0x423   :  { %1820 = vmatprep.subr.bf16.mxu0 %v3932_v18 }
 0x424   :  { %3092 = vmatpush3.bf16.msra.mxu1 %v3271_v61 }
 0x425   :  { %3093 = vmatprep.subr.bf16.mxu1 %v3384_v37 }
 0x426   :  { %1821 = vmatpush1.bf16.msra.mxu0 %v3938_v20 }
 0x427   :  { %1822 = vmatprep.subr.bf16.mxu0 %v3947_v23 }
 0x428   :  { %3094 = vmatpush3.bf16.msra.mxu1 %v3272_v56 }
 0x429   :  { %3095 = vmatprep.subr.bf16.mxu1 %v3384_v37 }
 0x42a   :  { %1823 = vmatpush1.bf16.msra.mxu0 %v3953_v24 }
 0x42b   :  { %1824 = vmatprep.subr.bf16.mxu0 %v3963_v26 }
 0x42c   :  { %3096 = vmatpush3.bf16.msra.mxu1 %v3273_v62 }
 0x42d   :  { %3097 = vmatprep.subr.bf16.mxu1 %v3384_v37 }
 0x42e   :  { %1825 = vmatpush1.bf16.msra.mxu0 %v3969_v27 }
 0x42f   :  { %1826 = vmatprep.subr.bf16.mxu0 %v3979_v29 }
 0x430   :  { %3098 = vmatpush3.bf16.msra.mxu1 %v3274_v0  ;;  %v3278_v0 = vld [vmem:[%s4285_s4 + $0x98] ss:$12 sps:$4 sm:$0xff]  }
 0x431   :  { %3099 = vmatprep.subr.bf16.mxu1 %v3384_v37 }
 0x432   :  { %1827 = vmatpush1.bf16.msra.mxu0 %v3985_v30 }
 0x433   :  { %1828 = vmatprep.subr.bf16.mxu0 %v3995_v32 }
 0x434   :  { %3100 = vmatpush3.bf16.msra.mxu1 %v3275_v2  ;;  %v3279_v2 = vld [vmem:[%s4285_s4 + $0x80] ss:$12 sps:$4 sm:$0xff]  }
 0x435   :  { %3101 = vmatprep.subr.bf16.mxu1 %v3384_v37 }
 0x436   :  { %1829 = vmatpush1.bf16.msra.mxu0 %v4001_v33 }
 0x437   :  { %2086 = vmatprep.subr.bf16.mxu0 %v3885_v57 }
 0x438   :  { %3102 = vmatpush3.bf16.msra.mxu1 %v3276_v5  ;;  %v3281_v5 = vld [vmem:[%s4285_s4 + $0x50] ss:$12 sps:$4 sm:$0xff]  }
 0x439   :  { %3107 = vmatprep.subr.bf16.mxu1 %v3384_v37 }
 0x4d9   :  { %v1576_v10 = vpop.f32.mrf.mxu0  ;;  %v1617_v12 = vpop.f32.mrf.mxu1 }
 0x4da   :  { %v1629_v15 = vadd.f32 %v1576_v10, %v3709_v43  ;;  %v1643_v21 = vadd.f32 %v3734_v42, %v1617_v12  ;;  %v3282_v10 = vld [vmem:[%s4285_s4 + $0x38] ss:$12 sps:$4 sm:$0xff]   ;;  %v3283_v12 = vld [vmem:[%s4285_s4 + $0x20] ss:$12 sps:$4 sm:$0xff]  }
 0x4db   :  { %v1578_v4 = vpop.f32.mrf.mxu0  ;;  %v3085_v35 = vpop.f32.mrf.mxu1 }
 0x4dc   :  { %v2799_v34 = vmul.f32 -1.442695, %v1629_v15  ;;  %v1636_v22 = vadd.f32 %v1578_v4, %v3712_v45  ;;  %v3284_v15 = vld [vmem:[%s4285_s4 + $0x8] ss:$12 sps:$4 sm:$0xff]  }
 0x4dd   :  { %v1580_v55 = vpop.f32.mrf.mxu0  ;;  %v1620_v1 = vpop.f32.mrf.mxu1 }
 0x4de   :  { %3341 = vpow2.f32 %v2799_v34  ;;  %v2800_v39 = vmul.f32 -1.442695, %v1636_v22 }
 0x4df   :  { %v1581_v7 = vpop.f32.mrf.mxu0  ;;  %v3086_v58 = vpop.f32.mrf.mxu1 }
 0x4e0   :  { %3343 = vpow2.f32 %v2800_v39 }
 0x4eb   :  { %v3342_v59 = vpop.eup %3341 }
 0x4ec   :  { %v1633_v6 = vadd.f32 1.0, %v3342_v59 }
 0x4ed   :  { %v3344_v48 = vpop.eup %3343 }
 0x4ee   :  { %3345 = vrcp.f32 %v1633_v6  ;;  %v1640_v17 = vadd.f32 1.0, %v3344_v48 }
 0x4f0   :  { %3347 = vrcp.f32 %v1640_v17 }
 0x4fb   :  { %v3346_v43 = vpop.eup %3345 }
 0x4fc   :  { %v1644_v25 = vmul.f32 %v3346_v43, %v1643_v21 }
 0x4fd   :  { %v3348_v31 = vpop.eup %3347 }
 0x4fe   :  { %v1645_v41 = vadd.f32 %v1644_v25, %v3688_v14  ;;  %v1647_v63 = vsub.f32 1.0, %v3348_v31  ;;  %v1649_v45 = vmul.f32 %v3348_v31, %v4016_v28  ;;  %v3277_v14 = vld [vmem:[%s4285_s4 + $0xb0] ss:$12 sps:$4 sm:$0xff]  }
 0x500   :  { %3349 = vtanh.f32 %v1645_v41 }
 0x50d   :  { %v3350_v3 = vpop.eup %3349 }
 0x50e   :  { %v1648_v61 = vmul.f32 %v3350_v3, %v1647_v63 }
 0x510   :  { %v4080_v56 = vadd.f32 %v1649_v45, %v1648_v61 }
 0x512   :  { %v1653_v62 = vpack.c.bf16 %v4080_v56, %v4080_v56  ;;  %2638 = vst [vmem:[%s4289_s9 + $0x20] sm:$0xff] %v4080_v56 }
 0x514   :  { %1847 = vmatmul.mubr.bf16.vlgmr.msra.gmra.mxu0 %v1653_v62  ;;  %3104 = vmatmul.mubr.bf16.vlgmr.msra.gmra.mxu1 %v1653_v62 }
 0x515   :  { %2087 = vmatpush1.bf16.msra.mxu0 %v3890_v36  ;;  %2118 = vmatprep.mubr.bf16.mxu0 %v3383_v8 }
 0x516   :  { %2088 = vmatprep.subr.bf16.mxu0 %v3900_v40  ;;  %3123 = vmatprep.mubr.msk.bf16.mxu1 %vm3385_vm2, %v3384_v37 }
 0x517   :  { %3108 = vmatpush3.bf16.msra.mxu1 %v3277_v14 }
 0x518   :  { %3109 = vmatprep.subr.bf16.mxu1 %v3384_v37 }
 0x519   :  { %2089 = vmatpush1.bf16.msra.mxu0 %v3906_v44 }
 0x51a   :  { %2090 = vmatprep.subr.bf16.mxu0 %v3916_v50 }
 0x51b   :  { %3110 = vmatpush3.bf16.msra.mxu1 %v3278_v0 }
 0x51c   :  { %3111 = vmatprep.subr.bf16.mxu1 %v3384_v37 }
 0x51d   :  { %2091 = vmatpush1.bf16.msra.mxu0 %v3922_v53 }
 0x51e   :  { %2092 = vmatprep.subr.bf16.mxu0 %v3932_v18 }
 0x51f   :  { %3112 = vmatpush3.bf16.msra.mxu1 %v3279_v2 }
 0x520   :  { %3113 = vmatprep.subr.bf16.mxu1 %v3384_v37 }
 0x521   :  { %2093 = vmatpush1.bf16.msra.mxu0 %v3938_v20 }
 0x522   :  { %2094 = vmatprep.subr.bf16.mxu0 %v3947_v23 }
 0x525   :  { %2095 = vmatpush1.bf16.msra.mxu0 %v3953_v24 }
 0x526   :  { %2096 = vmatprep.subr.bf16.mxu0 %v3963_v26 }
 0x529   :  { %2097 = vmatpush1.bf16.msra.mxu0 %v3969_v27 }
 0x52a   :  { %2098 = vmatprep.subr.bf16.mxu0 %v3979_v29 }
 0x52d   :  { %2099 = vmatpush1.bf16.msra.mxu0 %v3985_v30 }
 0x52e   :  { %2100 = vmatprep.subr.bf16.mxu0 %v3995_v32 }
 0x531   :  { %2101 = vmatpush1.bf16.msra.mxu0 %v4001_v33 }
 0x532   :  { %2358 = vmatprep.subr.bf16.mxu0 %v3885_v57  ;;  %v3280_v57 = vld [vmem:[%s4285_s4 + $0x68] ss:$12 sps:$4 sm:$0xff]  }
 0x533   :  { %3114 = vmatpush3.bf16.msra.mxu1 %v3280_v57 }
 0x534   :  { %3115 = vmatprep.subr.bf16.mxu1 %v3384_v37 }
 0x537   :  { %3116 = vmatpush3.bf16.msra.mxu1 %v3281_v5 }
 0x538   :  { %3117 = vmatprep.subr.bf16.mxu1 %v3384_v37 }
 0x53b   :  { %3118 = vmatpush3.bf16.msra.mxu1 %v3282_v10 }
 0x53c   :  { %3119 = vmatprep.subr.bf16.mxu1 %v3384_v37 }
 0x53f   :  { %3120 = vmatpush3.bf16.msra.mxu1 %v3283_v12 }
 0x540   :  { %3121 = vmatprep.subr.bf16.mxu1 %v3384_v37 }
 0x543   :  { %3122 = vmatpush3.bf16.msra.mxu1 %v3284_v15 }
 0x544   :  { %3127 = vmatprep.subr.bf16.mxu1 %v3384_v37 }
 0x5d4   :  { %v1848_v4 = vpop.f32.mrf.mxu0  ;;  %v1889_v35 = vpop.f32.mrf.mxu1 }
 0x5d5   :  { %v1901_v34 = vadd.f32 %v1848_v4, %v3715_v47  ;;  %v1915_v41 = vadd.f32 %v3734_v42, %v1889_v35 }
 0x5d6   :  { %v1850_v55 = vpop.f32.mrf.mxu0  ;;  %v3105_v1 = vpop.f32.mrf.mxu1 }
 0x5d7   :  { %v2825_v7 = vmul.f32 -1.442695, %v1901_v34  ;;  %v1908_v6 = vadd.f32 %v1850_v55, %v3718_v49 }
 0x5d8   :  { %v1852_v58 = vpop.f32.mrf.mxu0  ;;  %v1892_v22 = vpop.f32.mrf.mxu1 }
 0x5d9   :  { %3351 = vpow2.f32 %v2825_v7  ;;  %v2826_v48 = vmul.f32 -1.442695, %v1908_v6  ;;  %v3295_v6 = vld [vmem:[%s4290_s6 + $0x28] sm:$0xff]  }
 0x5da   :  { %v1853_v39 = vpop.f32.mrf.mxu0  ;;  %v3106_v59 = vpop.f32.mrf.mxu1 }
 0x5db   :  { %3353 = vpow2.f32 %v2826_v48  ;;  %v3296_v48 = vld [vmem:[%s4290_s6 + $0x20] sm:$0xff]  }
 0x5e6   :  { %v3352_v17 = vpop.eup %3351 }
 0x5e7   :  { %v1905_v21 = vadd.f32 1.0, %v3352_v17  ;;  %v3299_v17 = vld [vmem:[%s4290_s6 + $0x8] sm:$0xff]  }
 0x5e8   :  { %v3354_v43 = vpop.eup %3353 }
 0x5e9   :  { %3355 = vrcp.f32 %v1905_v21  ;;  %v1912_v25 = vadd.f32 1.0, %v3354_v43  ;;  %v3300_v21 = vld [vmem:[%s4290_s6] sm:$0xff]   ;;  %v2479_v43 = vpack.c.bf16 %v4016_v28, %v3871_v11 }
 0x5eb   :  { %3357 = vrcp.f32 %v1912_v25 }
 0x5f6   :  { %v3356_v47 = vpop.eup %3355 }
 0x5f7   :  { %v1916_v31 = vmul.f32 %v3356_v47, %v1915_v41 }
 0x5f8   :  { %v3358_v3 = vpop.eup %3357 }
 0x5f9   :  { %v1917_v63 = vadd.f32 %v1916_v31, %v3700_v38  ;;  %v1919_v61 = vsub.f32 1.0, %v3358_v3  ;;  %v1921_v49 = vmul.f32 %v3358_v3, %v4080_v56  ;;  %v3286_v38 = vld [vmem:[%s4285_s4 + $0x98] ss:$12 sps:$4 sm:$0xff]  }
 0x5fb   :  { %3359 = vtanh.f32 %v1917_v63 }
 0x608   :  { %v3360_v45 = vpop.eup %3359 }
 0x609   :  { %v1920_v62 = vmul.f32 %v3360_v45, %v1919_v61 }
 0x60b   :  { %v4144_v14 = vadd.f32 %v1921_v49, %v1920_v62  ;;  %v195_v49 = vadd.f32 %v3799_v46, %v3685_v13  ;;  %v3381_v13 = vld [vmem:[%s4288_s5] ss:$0 sm:$0xff] }
 0x60d   :  { %v1925_v0 = vpack.c.bf16 %v4144_v14, %v4144_v14  ;;  %2639 = vst [vmem:[%s4289_s9 + $0x28] sm:$0xff] %v4144_v14  ;;  %v2480_v25 = vpack.c.bf16 %v4144_v14, %v4080_v56 }
 0x60f   :  { %2119 = vmatmul.mubr.bf16.vlgmr.msra.gmra.mxu0 %v1925_v0  ;;  %3124 = vmatmul.mubr.bf16.vlgmr.msra.gmra.mxu1 %v1925_v0 }
 0x610   :  { %2359 = vmatpush1.bf16.msra.mxu0 %v3890_v36  ;;  %2390 = vmatprep.mubr.bf16.mxu0 %v3383_v8  ;;  %v3285_v8 = vld [vmem:[%s4285_s4 + $0xb0] ss:$12 sps:$4 sm:$0xff]   ;;  %v3287_v36 = vld [vmem:[%s4285_s4 + $0x80] ss:$12 sps:$4 sm:$0xff]  }
 0x611   :  { %2360 = vmatprep.subr.bf16.mxu0 %v3900_v40  ;;  %3143 = vmatprep.mubr.msk.bf16.mxu1 %vm3385_vm2, %v3384_v37  ;;  %v3288_v40 = vld [vmem:[%s4285_s4 + $0x68] ss:$12 sps:$4 sm:$0xff]  }
 0x612   :  { %3128 = vmatpush3.bf16.msra.mxu1 %v3285_v8 }
 0x613   :  { %3129 = vmatprep.subr.bf16.mxu1 %v3384_v37 }
 0x614   :  { %2361 = vmatpush1.bf16.msra.mxu0 %v3906_v44  ;;  %v3289_v44 = vld [vmem:[%s4285_s4 + $0x50] ss:$12 sps:$4 sm:$0xff]  }
 0x615   :  { %2362 = vmatprep.subr.bf16.mxu0 %v3916_v50  ;;  %v3293_v50 = vld [vmem:[%s4290_s6 + $0x38] sm:$0xff]  }
 0x616   :  { %3130 = vmatpush3.bf16.msra.mxu1 %v3286_v38 }
 0x617   :  { %3131 = vmatprep.subr.bf16.mxu1 %v3384_v37 }
 0x618   :  { %2363 = vmatpush1.bf16.msra.mxu0 %v3922_v53  ;;  %v3290_v53 = vld [vmem:[%s4285_s4 + $0x38] ss:$12 sps:$4 sm:$0xff]  }
 0x619   :  { %2364 = vmatprep.subr.bf16.mxu0 %v3932_v18  ;;  %v3291_v18 = vld [vmem:[%s4285_s4 + $0x20] ss:$12 sps:$4 sm:$0xff]  }
 0x61a   :  { %3132 = vmatpush3.bf16.msra.mxu1 %v3287_v36 }
 0x61b   :  { %3133 = vmatprep.subr.bf16.mxu1 %v3384_v37 }
 0x61c   :  { %2365 = vmatpush1.bf16.msra.mxu0 %v3938_v20  ;;  %v3292_v20 = vld [vmem:[%s4285_s4 + $0x8] ss:$12 sps:$4 sm:$0xff]  }
 0x61d   :  { %2366 = vmatprep.subr.bf16.mxu0 %v3947_v23 }
 0x61e   :  { %3134 = vmatpush3.bf16.msra.mxu1 %v3288_v40 }
 0x61f   :  { %3135 = vmatprep.subr.bf16.mxu1 %v3384_v37 }
 0x620   :  { %2367 = vmatpush1.bf16.msra.mxu0 %v3953_v24 }
 0x621   :  { %2368 = vmatprep.subr.bf16.mxu0 %v3963_v26 }
 0x622   :  { %3136 = vmatpush3.bf16.msra.mxu1 %v3289_v44 }
 0x623   :  { %3137 = vmatprep.subr.bf16.mxu1 %v3384_v37 }
 0x624   :  { %2369 = vmatpush1.bf16.msra.mxu0 %v3969_v27 }
 0x625   :  { %2370 = vmatprep.subr.bf16.mxu0 %v3979_v29 }
 0x626   :  { %3138 = vmatpush3.bf16.msra.mxu1 %v3290_v53 }
 0x627   :  { %3139 = vmatprep.subr.bf16.mxu1 %v3384_v37 }
 0x628   :  { %2371 = vmatpush1.bf16.msra.mxu0 %v3985_v30 }
 0x629   :  { %2372 = vmatprep.subr.bf16.mxu0 %v3995_v32 }
 0x62a   :  { %3140 = vmatpush3.bf16.msra.mxu1 %v3291_v18 }
 0x62b   :  { %3141 = vmatprep.subr.bf16.mxu1 %v3384_v37 }
 0x62c   :  { %2373 = vmatpush1.bf16.msra.mxu0 %v4001_v33 }
 0x62d   :  { %3147 = vmatprep.subr.bf16.mxu0 %v3293_v50 }
 0x62e   :  { %3142 = vmatpush3.bf16.msra.mxu1 %v3292_v20 }
 0x6cf   :  { %v2120_v23 = vpop.f32.mrf.mxu0  ;;  %v2161_v24 = vpop.f32.mrf.mxu1 }
 0x6d0   :  { %v2173_v26 = vadd.f32 %v2120_v23, %v3721_v51  ;;  %v2187_v35 = vadd.f32 %v3734_v42, %v2161_v24  ;;  %v2478_v42 = vpack.c.bf16 %v3808_v52, %v3740_v16  ;;  %v3297_v16 = vld [vmem:[%s4290_s6 + $0x18] sm:$0xff]   ;;  %v3298_v52 = vld [vmem:[%s4290_s6 + $0x10] sm:$0xff]  }
 0x6d1   :  { %v2122_v27 = vpop.f32.mrf.mxu0  ;;  %v3125_v29 = vpop.f32.mrf.mxu1 }
 0x6d2   :  { %v2851_v30 = vmul.f32 -1.442695, %v2173_v26  ;;  %v2180_v5 = vadd.f32 %v2122_v27, %v3725_v54 }
 0x6d3   :  { %v2124_v32 = vpop.f32.mrf.mxu0  ;;  %v2164_v33 = vpop.f32.mrf.mxu1 }
 0x6d4   :  { %3361 = vpow2.f32 %v2851_v30  ;;  %v2852_v10 = vmul.f32 -1.442695, %v2180_v5 }
 0x6d5   :  { %v2125_v2 = vpop.f32.mrf.mxu0  ;;  %v3126_v57 = vpop.f32.mrf.mxu1 }
 0x6d6   :  { %3363 = vpow2.f32 %v2852_v10 }
 0x6e1   :  { %v3362_v12 = vpop.eup %3361 }
 0x6e2   :  { %v2177_v15 = vadd.f32 1.0, %v3362_v12 }
 0x6e3   :  { %v3364_v37 = vpop.eup %3363 }
 0x6e4   :  { %3365 = vrcp.f32 %v2177_v15  ;;  %v2184_v4 = vadd.f32 1.0, %v3364_v37 }
 0x6e6   :  { %3367 = vrcp.f32 %v2184_v4 }
 0x6f1   :  { %v3366_v51 = vpop.eup %3365 }
 0x6f2   :  { %v2188_v34 = vmul.f32 %v3366_v51, %v2187_v35 }
 0x6f3   :  { %v3368_v1 = vpop.eup %3367 }
 0x6f4   :  { %v2189_v55 = vadd.f32 %v2188_v34, %v3683_v9  ;;  %v2191_v7 = vsub.f32 1.0, %v3368_v1  ;;  %v2193_v54 = vmul.f32 %v3368_v1, %v4144_v14  ;;  %v3294_v9 = vld [vmem:[%s4290_s6 + $0x30] sm:$0xff]  }
 0x6f6   :  { %3369 = vtanh.f32 %v2189_v55 }
 0x703   :  { %v3370_v58 = vpop.eup %3369 }
 0x704   :  { %v2192_v22 = vmul.f32 %v3370_v58, %v2191_v7 }
 0x706   :  { %v4209_v39 = vadd.f32 %v2193_v54, %v2192_v22 }
 0x708   :  { %v2197_v59 = vpack.c.bf16 %v4209_v39, %v4209_v39  ;;  %2640 = vst [vmem:[%s4289_s9 + $0x30] sm:$0xff] %v4209_v39 }
 0x70a   :  { %2391 = vmatmul.mubr.bf16.vlgmr.msra.gmra.mxu0 %v2197_v59  ;;  %3144 = vmatmul.mubr.bf16.vlgmr.msra.gmra.mxu1 %v2197_v59 }
 0x70b   :  { %3148 = vmatpush3.bf16.msra.mxu0 %v3293_v50  ;;  %3163 = vmatprep.mubr.bf16.mxu0 %v2478_v42 }
 0x70c   :  { %3149 = vmatprep.subr.bf16.mxu0 %v3294_v9 }
 0x70f   :  { %3150 = vmatpush3.bf16.msra.mxu0 %v3294_v9 }
 0x710   :  { %3151 = vmatprep.subr.bf16.mxu0 %v3295_v6 }
 0x713   :  { %3152 = vmatpush3.bf16.msra.mxu0 %v3295_v6 }
 0x714   :  { %3153 = vmatprep.subr.bf16.mxu0 %v3296_v48 }
 0x717   :  { %3154 = vmatpush3.bf16.msra.mxu0 %v3296_v48 }
 0x718   :  { %3155 = vmatprep.subr.bf16.mxu0 %v3297_v16 }
 0x71b   :  { %3156 = vmatpush3.bf16.msra.mxu0 %v3297_v16 }
 0x71c   :  { %3157 = vmatprep.subr.bf16.mxu0 %v3298_v52 }
 0x71f   :  { %3158 = vmatpush3.bf16.msra.mxu0 %v3298_v52 }
 0x720   :  { %3159 = vmatprep.subr.bf16.mxu0 %v3299_v17 }
 0x723   :  { %3160 = vmatpush3.bf16.msra.mxu0 %v3299_v17 }
 0x724   :  { %3161 = vmatprep.subr.bf16.mxu0 %v3300_v21 }
 0x727   :  { %3162 = vmatpush3.bf16.msra.mxu0 %v3300_v21 }
 0x72a   :  { %3164 = vmatmul.mubr.bf16.vlgmr.msra.gmra.mxu0 %v2479_v43 }
 0x72b   :  { %3167 = vmatprep.mubr.bf16.mxu0 %v2480_v25 }
 0x7ca   :  { %v2392_v41 = vpop.f32.mrf.mxu0  ;;  %v2433_v47 = vpop.f32.mrf.mxu1 }
 0x7cb   :  { %v2445_v31 = vadd.f32 %v2392_v41, %v3728_v60  ;;  %v2879_v60 = vld [vmem:[%s4291_s7] ss:$0 sm:$0xff]  ;;  %v2459_v46 = vadd.f32 %v3381_v13, %v2433_v47 }
 0x7cc   :  { %v2394_v63 = vpop.f32.mrf.mxu0  ;;  %v3145_v3 = vpop.f32.mrf.mxu1 }
 0x7cd   :  { %v2877_v61 = vmul.f32 -1.442695, %v2445_v31  ;;  %v2452_v28 = vadd.f32 %v2394_v63, %v195_v49 }
 0x7ce   :  { %v2396_v45 = vpop.f32.mrf.mxu0  ;;  %v2436_v62 = vpop.f32.mrf.mxu1 }
 0x7cf   :  { %3371 = vpow2.f32 %v2877_v61  ;;  %v2878_v8 = vmul.f32 -1.442695, %v2452_v28 }
 0x7d0   :  { %v2397_v0 = vpop.f32.mrf.mxu0  ;;  %v3146_v11 = vpop.f32.mrf.mxu1 }
 0x7d1   :  { %3373 = vpow2.f32 %v2878_v8 }
 0x7dc   :  { %v3372_v56 = vpop.eup %3371 }
 0x7dd   :  { %v2449_v14 = vadd.f32 1.0, %v3372_v56 }
 0x7de   :  { %v3374_v38 = vpop.eup %3373 }
 0x7df   :  { %3375 = vrcp.f32 %v2449_v14  ;;  %v2456_v36 = vadd.f32 1.0, %v3374_v38 }
 0x7e1   :  { %3377 = vrcp.f32 %v2456_v36 }
 0x7ea   :  { %v3165_v40 = vpop.f32.mrf.mxu0 }
 0x7eb   :  { %v2596_v44 = vadd.f32 %v3165_v40, %v2879_v60 }
 0x7ec   :  { %v3376_v50 = vpop.eup %3375  ;;  %v2587_v53 = vpop.f32.mrf.mxu0 }
 0x7ed   :  { %v2460_v18 = vmul.f32 %v3376_v50, %v2459_v46  ;;  %2620 = vst [vmem:[%s4292_s8 + $0x10] sm:$0xff] %v2596_v44  ;;  %v2588_v20 = vadd.f32 %v2879_v60, %v2587_v53 }
 0x7ee   :  { %v3166_v23 = vpop.f32.mrf.mxu0  ;;  %v3378_v30 = vpop.eup %3377 }
 0x7ef   :  { %v2461_v24 = vadd.f32 %v2460_v18, %v3694_v19  ;;  %2618 = vst [vmem:[%s4292_s8] sm:$0xff] %v2588_v20  ;;  %v2599_v26 = vadd.f32 %v3166_v23, %v2879_v60  ;;  %v2463_v32 = vsub.f32 1.0, %v3378_v30  ;;  %v2465_v2 = vmul.f32 %v3378_v30, %v4209_v39 }
 0x7f0   :  { %v2590_v27 = vpop.f32.mrf.mxu0 }
 0x7f1   :  { %3379 = vtanh.f32 %v2461_v24  ;;  %2621 = vst [vmem:[%s4292_s8 + $0x18] sm:$0xff] %v2599_v26  ;;  %v2591_v29 = vadd.f32 %v2879_v60, %v2590_v27 }
 0x7f3   :  { %2619 = vst [vmem:[%s4292_s8 + $0x8] sm:$0xff] %v2591_v29 }
 0x7fe   :  { %v3380_v33 = vpop.eup %3379 }
 0x7ff   :  { %v2464_v19 = vmul.f32 %v3380_v33, %v2463_v32 }
 0x801   :  { %v2466_v57 = vadd.f32 %v2465_v2, %v2464_v19 }
 0x803   :  { %v2481_v5 = vpack.c.bf16 %v2466_v57, %v4209_v39  ;;  %2641 = vst [vmem:[%s4289_s9 + $0x38] sm:$0xff] %v2466_v57 }
 0x805   :  { %3168 = vmatmul.mubr.bf16.gmra.mxu0 %v2481_v5 }
 0x8c5   :  { %v3169_v10 = vpop.f32.mrf.mxu0 }
 0x8c6   :  { %v2612_v12 = vadd.f32 %v3169_v10, %v2879_v60 }
 0x8c7   :  { %v2603_v15 = vpop.f32.mrf.mxu0 }
 0x8c8   :  { %2624 = vst [vmem:[%s4292_s8 + $0x30] sm:$0xff] %v2612_v12  ;;  %v2604_v37 = vadd.f32 %v2879_v60, %v2603_v15 }
 0x8c9   :  { %v3170_v4 = vpop.f32.mrf.mxu0 }
 0x8ca   :  { %2622 = vst [vmem:[%s4292_s8 + $0x20] sm:$0xff] %v2604_v37  ;;  %v2615_v35 = vadd.f32 %v3170_v4, %v2879_v60 }
 0x8cb   :  { %v2606_v51 = vpop.f32.mrf.mxu0 }
 0x8cc   :  { %2625 = vst [vmem:[%s4292_s8 + $0x38] sm:$0xff] %v2615_v35  ;;  %v2607_v34 = vadd.f32 %v2879_v60, %v2606_v51 }
 0x8ce   :  { %2623 = vst [vmem:[%s4292_s8 + $0x28] sm:$0xff] %v2607_v34 }

</bundles_post_ra>
